<compile_context>
chip_gen: v5e
topology: v5e:2x2
jax: 0.10.0
libtpu: 0.0.40
codegen_flags: <defaults>
</compile_context>

<pallas_src>
import functools

import jax
import jax.numpy as jnp
from jax.experimental import pallas as pl
from jax.experimental.pallas import tpu as pltpu


def _round_up(x, m):
    return (int(x) + m - 1) // m * m


def _softplus(x):
    # Numerically stable softplus; max/abs on the VPU, exp/log1p on the EUP.
    return jnp.maximum(x, 0.0) + jnp.log1p(jnp.exp(-jnp.abs(x)))


def dann_loss_kernel(fs_ref, ft_ref, w_ref, w1_ref, b1_ref, w2_ref, b2_ref,
                     out_ref, acc_ref, *, inv_total):
    # fs_ref / ft_ref : (TILE_M, F)  bf16 source / target feature tiles
    # w_ref           : (TILE_M, 2)  f32 per-sample BCE weights [w_s, w_t]
    # w1_ref : (F, H) bf16 ; b1_ref / w2_ref : (1, H) f32 ; b2_ref : (1, 1) f32
    # out_ref : (8, 128)  lane-dense slab holding this split's partial loss
    # acc_ref : (1, 1)    f32 running sum (scratch, carried along the inner axis)
    inner = pl.program_id(1)

    @pl.when(inner == 0)
    def _():
        acc_ref[...] = jnp.zeros_like(acc_ref)

    w1 = w1_ref[...]
    b1 = b1_ref[...]
    w2 = w2_ref[...]
    b2 = b2_ref[...]

    def logits(f):
        # bf16 x bf16 MXU matmul with f32 accumulation; the final Linear(H, 1) is a
        # broadcast-multiply + lane reduce instead of a degenerate (H, 1) matmul.
        h = jnp.maximum(jnp.dot(f, w1, preferred_element_type=jnp.float32) + b1, 0.0)
        return jnp.sum(h * w2, axis=-1, keepdims=True) + b2          # (TILE_M, 1) f32

    z_s = logits(fs_ref[...])
    z_t = logits(ft_ref[...])

    # BCE from logits: source label 1 -> -log(D)   = softplus(-z)
    #                  target label 0 -> -log(1-D) = softplus( z)
    # min(., 100) reproduces torch's log clamp at -100.  Padded rows carry zero weight.
    w_tile = w_ref[...]                                               # (TILE_M, 2)
    per = (jnp.minimum(_softplus(-z_s), 100.0) * w_tile[:, 0:1]
           + jnp.minimum(_softplus(z_t), 100.0) * w_tile[:, 1:2])
    # NOTE: the (TILE_M, 1) epilogue is lane-sparse but fully hidden under the matmul
    # here; a (TILE_M//128, 128) relayout would only matter for very small F/H.

    acc_ref[...] += jnp.sum(per, axis=0, keepdims=True)

    @pl.when(inner == pl.num_programs(1) - 1)
    def _():
        # 0.5*(mean_s + mean_t) == sum(all weighted terms) / (2N) since n_s == n_t.
        out_ref[...] = jnp.broadcast_to(acc_ref[...] * inv_total, (8, 128))

    # TODO(synk): domain_discriminator_accuracy (a stateful side attribute of the torch
    # module, not part of the forward return value) is not computed in-kernel.


def _vmem_budget_bytes():
    # Generation-aware budget: v5e/v6e have 128 MiB VMEM per core, v7x only 64 MiB.
    try:
        cap = int(pltpu.get_tpu_info().vmem_capacity_bytes)
    except Exception:
        cap = 64 * 2 ** 20          # conservative default (v7x-sized)
    return max(16 * 2 ** 20, int(0.6 * cap))


def _vmem_estimate(tile_m, feat, hidden, feat_itemsize):
    # Padded VMEM bytes: lane dim pads to 128, small sublane dims to 8.
    lane = lambda x: _round_up(x, 128)
    feats = 2 * 2 * tile_m * lane(feat) * feat_itemsize        # f_s/f_t tiles, double-buffered
    wts = 2 * tile_m * lane(2) * 4                             # merged (TILE_M, 2) weight tile
    params = (_round_up(feat, 16) * lane(hidden) * feat_itemsize
              + 2 * 8 * lane(hidden) * 4 + 8 * 128 * 4)        # w1, b1, w2, b2
    act = 2 * tile_m * lane(hidden) * 4 + 6 * tile_m * 128 * 4 # ReLU activations + epilogue
    out = 2 * 8 * 128 * 4
    return feats + wts + params + act + out


def _choose_tile_m(n, feat, hidden, feat_itemsize, budget, max_tile_m=None):
    # Batch tile: multiple of 16 (bf16 sublane packing), as large as the VMEM budget allows
    # (fewer grid steps -> less per-step overhead), capped at 2048 rows.
    n16 = _round_up(max(int(n), 1), 16)
    cap = 2048 if max_tile_m is None else max(16, (int(max_tile_m) // 16) * 16)
    tile = max(16, (min(cap, n16) // 16) * 16)
    while tile > 16 and 2 * _vmem_estimate(tile, feat, hidden, feat_itemsize) > budget:
        tile = max(16, _round_up(tile // 2, 16))
    return tile


def domain_adversarial_loss(f_s, f_t, w1, b1, w2, b2, w_s=None, w_t=None, *,
                            max_tile_m=None):
    n, feat = f_s.shape
    n_t, feat_t = f_t.shape
    assert feat == feat_t and n == n_t, "source/target batches must match (like d.chunk(2))"
    hidden = w1.shape[1]

    # per-instance BCE weights, merged into one (N, 2) input (single per-step DMA)
    w_s = jnp.ones((n,), jnp.float32) if w_s is None else w_s.reshape(-1).astype(jnp.float32)
    w_t = jnp.ones((n,), jnp.float32) if w_t is None else w_t.reshape(-1).astype(jnp.float32)
    w_st = jnp.stack([w_s, w_t], axis=1)                        # (N, 2)

    # bf16 feature / weight traffic (f32 accumulation happens inside the kernel)
    f_s16 = f_s.astype(jnp.bfloat16)
    f_t16 = f_t.astype(jnp.bfloat16)
    w1_16 = w1.astype(jnp.bfloat16)

    # pad hidden dim to a multiple of 128 (zero-extended -> identical logits)
    hp = _round_up(hidden, 128)
    if hp != hidden:
        w1_16 = jnp.pad(w1_16, ((0, 0), (0, hp - hidden)))
        b1 = jnp.pad(b1.reshape(-1), (0, hp - hidden))
        w2 = jnp.pad(w2.reshape(-1), (0, hp - hidden))
    b1_2d = b1.reshape(1, hp).astype(jnp.float32)
    w2_2d = w2.reshape(1, hp).astype(jnp.float32)
    b2_2d = b2.reshape(1, 1).astype(jnp.float32)

    # batch tiling: pad N up to a multiple of the tile (padded rows get zero weight)
    budget = _vmem_budget_bytes()
    tile_m = _choose_tile_m(n, feat, hp, 2, budget, max_tile_m)
    n_pad = _round_up(n, tile_m)
    if n_pad != n:
        pad = n_pad - n
        f_s16 = jnp.pad(f_s16, ((0, pad), (0, 0)))
        f_t16 = jnp.pad(f_t16, ((0, pad), (0, 0)))
        w_st = jnp.pad(w_st, ((0, pad), (0, 0)))

    n_tiles = n_pad // tile_m
    n_outer = 2 if (n_tiles >= 2 and n_tiles % 2 == 0) else 1   # 2-TC split (v7x); loop elsewhere
    n_inner = n_tiles // n_outer

    est = _vmem_estimate(tile_m, feat, hp, 2)
    vmem_limit = int(min(budget, max(16 * 2 ** 20, 2 * est + 2 * 2 ** 20)))

    kernel = functools.partial(dann_loss_kernel, inv_total=1.0 / (2.0 * n))

    def build(single_buffer_params):
        def param_spec(shape):
            if single_buffer_params:
                return pl.BlockSpec(shape, lambda o, i: (0, 0),
                                    pipeline_mode=pl.Buffered(1))
            return pl.BlockSpec(shape, lambda o, i: (0, 0))

        return pl.pallas_call(
            kernel,
            out_shape=jax.ShapeDtypeStruct((n_outer * 8, 128), jnp.float32),
            grid_spec=pltpu.PrefetchScalarGridSpec(
                num_scalar_prefetch=0,
                grid=(n_outer, n_inner),
                in_specs=[
                    pl.BlockSpec((tile_m, feat), lambda o, i: (o * n_inner + i, 0)),  # f_s
                    pl.BlockSpec((tile_m, feat), lambda o, i: (o * n_inner + i, 0)),  # f_t
                    pl.BlockSpec((tile_m, 2), lambda o, i: (o * n_inner + i, 0)),     # [w_s,w_t]
                    param_spec((feat, hp)),                                           # w1
                    param_spec((1, hp)),                                              # b1
                    param_spec((1, hp)),                                              # w2
                    param_spec((1, 1)),                                               # b2
                ],
                out_specs=pl.BlockSpec((8, 128), lambda o, i: (o, 0)),
                scratch_shapes=[pltpu.VMEM((1, 1), jnp.float32)],
            ),
            compiler_params=pltpu.CompilerParams(
                dimension_semantics=("parallel", "arbitrary"),
                vmem_limit_bytes=vmem_limit,
            ),
        )

    args = (f_s16, f_t16, w_st, w1_16, b1_2d, w2_2d, b2_2d)
    try:
        out = build(True)(*args)
        out = jax.block_until_ready(out)
    except Exception:
        # Single-buffered constant params not supported on this jax build: fall back to
        # the default double-buffered pipeline (costs one extra resident copy of w1).
        out = build(False)(*args)

    # Sum the per-split partial losses (each already scaled by 1/(2N)).
    return jnp.sum(out[0::8, 0])


def _reference(f_s, f_t, w1, b1, w2, b2, w_s, w_t):
    # Plain-JAX reference of the torch forward (sigmoid + clamped-log BCE), mirroring the
    # kernel's bf16 feature/w1 quantization with exact f32 accumulation.
    f = jnp.concatenate([f_s, f_t], axis=0).astype(jnp.bfloat16).astype(jnp.float32)
    w1q = w1.astype(jnp.bfloat16).astype(jnp.float32)
    h = jnp.maximum(jax.lax.dot(f, w1q, precision=jax.lax.Precision.HIGHEST)
                    + b1.reshape(1, -1), 0.0)
    z = jnp.sum(h * w2.reshape(1, -1), axis=-1, keepdims=True) + b2.reshape(1, 1)
    d = jax.nn.sigmoid(z)
    n = f_s.shape[0]
    d_s, d_t = d[:n], d[n:]
    bce_s = jnp.mean(w_s.reshape(-1, 1) * (-jnp.maximum(jnp.log(d_s), -100.0)))
    bce_t = jnp.mean(w_t.reshape(-1, 1) * (-jnp.maximum(jnp.log(1.0 - d_t), -100.0)))
    return 0.5 * (bce_s + bce_t)


if __name__ == "__main__":
    key = jax.random.PRNGKey(0)
    N, F, H = 96, 128, 64
    ks = jax.random.split(key, 8)

    # deterministic synthetic discriminator parameters (Linear(F,H)->ReLU->Linear(H,1)->Sigmoid)
    w1 = jax.random.normal(ks[0], (F, H), jnp.float32) * 0.1
    b1 = jax.random.normal(ks[1], (H,), jnp.float32) * 0.01
    w2 = jax.random.normal(ks[2], (H,), jnp.float32) * 0.1
    b2 = jax.random.normal(ks[3], (1,), jnp.float32) * 0.01

    # source / target features and per-instance weights
    f_s = jax.random.normal(ks[4], (N, F), jnp.float32)
    f_t = jax.random.normal(ks[5], (N, F), jnp.float32)
    w_s = jax.random.uniform(ks[6], (N,), jnp.float32, 0.5, 1.5)
    w_t = jax.random.uniform(ks[7], (N,), jnp.float32, 0.5, 1.5)

    loss = domain_adversarial_loss(f_s, f_t, w1, b1, w2, b2, w_s, w_t)
    loss = jax.block_until_ready(loss)
    ref = _reference(f_s, f_t, w1, b1, w2, b2, w_s, w_t)
    assert jnp.allclose(loss, ref, rtol=1e-4, atol=1e-5), (loss, ref)

    # Second config: awkward N (padding + zero-weight tail), forced small tile so the grid
    # has multiple steps and a 2-way core-parallel outer split; default (ones) weights.
    N2 = 100
    f_s2 = jax.random.normal(ks[4], (N2, F), jnp.float32)
    f_t2 = jax.random.normal(ks[5], (N2, F), jnp.float32)
    loss2 = domain_adversarial_loss(f_s2, f_t2, w1, b1, w2, b2, max_tile_m=32)
    loss2 = jax.block_until_ready(loss2)
    ref2 = _reference(f_s2, f_t2, w1, b1, w2, b2,
                      jnp.ones((N2,), jnp.float32), jnp.ones((N2,), jnp.float32))
    assert jnp.allclose(loss2, ref2, rtol=1e-4, atol=1e-5), (loss2, ref2)

    print("KERNEL_OK")
</pallas_src>

<mosaic_0001>
module attributes {stable_mosaic.version = 11 : i64} {
  func.func @dann_loss_kernel(%arg0: i32, %arg1: i32, %arg2: memref<96x128xbf16, #tpu.memory_space<vmem>>, %arg3: memref<96x128xbf16, #tpu.memory_space<vmem>>, %arg4: memref<96x2xf32, #tpu.memory_space<vmem>>, %arg5: memref<128x128xbf16, #tpu.memory_space<vmem>>, %arg6: memref<1x128xf32, #tpu.memory_space<vmem>>, %arg7: memref<1x128xf32, #tpu.memory_space<vmem>>, %arg8: memref<1x1xf32, #tpu.memory_space<vmem>>, %arg9: memref<8x128xf32, #tpu.memory_space<vmem>>, %arg10: memref<1x1xf32, #tpu.memory_space<vmem>>) attributes {dimension_semantics = [#tpu.dimension_semantics<parallel>, #tpu.dimension_semantics<arbitrary>], iteration_bounds = array<i64: 1, 1>, scalar_prefetch = 0 : i64, scratch_operands = 1 : i64, tpu.core_type = #tpu.core_type<tc>, window_params = [{transform_indices = @transform_0, window_bounds = array<i64: 96, 128>}, {transform_indices = @transform_1, window_bounds = array<i64: 96, 128>}, {transform_indices = @transform_2, window_bounds = array<i64: 96, 2>}, {pipeline_mode = #tpu.pipeline_mode<synchronous>, transform_indices = @transform_3, window_bounds = array<i64: 128, 128>}, {pipeline_mode = #tpu.pipeline_mode<synchronous>, transform_indices = @transform_4, window_bounds = array<i64: 1, 128>}, {pipeline_mode = #tpu.pipeline_mode<synchronous>, transform_indices = @transform_5, window_bounds = array<i64: 1, 128>}, {pipeline_mode = #tpu.pipeline_mode<synchronous>, transform_indices = @transform_6, window_bounds = array<i64: 1, 1>}, {transform_indices = @transform_7, window_bounds = array<i64: 8, 128>}]} {
    %c0_i32 = arith.constant 0 : i32
    %0 = arith.cmpi eq, %arg1, %c0_i32 : i32
    %1 = arith.extui %0 : i1 to i32
    %c0_i32_0 = arith.constant 0 : i32
    %2 = arith.cmpi ne, %1, %c0_i32_0 : i32
    scf.if %2 {
      %cst_33 = arith.constant 0.000000e+00 : f32
      %67 = vector.broadcast %cst_33 : f32 to vector<1x1xf32>
      %c0_34 = arith.constant 0 : index
      %c0_35 = arith.constant 0 : index
      %68 = vector.load %arg10[%c0_34, %c0_35] : memref<1x1xf32, #tpu.memory_space<vmem>>, vector<1x1xf32>
      tpu.vector_store %arg10[%c0_34, %c0_35], %67 {strides = array<i32>} : memref<1x1xf32, #tpu.memory_space<vmem>>, vector<1x1xf32>,
    } else {
    }
    %c0 = arith.constant 0 : index
    %c0_1 = arith.constant 0 : index
    %3 = vector.load %arg5[%c0, %c0_1] : memref<128x128xbf16, #tpu.memory_space<vmem>>, vector<128x128xbf16>
    %c0_2 = arith.constant 0 : index
    %c0_3 = arith.constant 0 : index
    %4 = vector.load %arg6[%c0_2, %c0_3] : memref<1x128xf32, #tpu.memory_space<vmem>>, vector<1x128xf32>
    %c0_4 = arith.constant 0 : index
    %c0_5 = arith.constant 0 : index
    %5 = vector.load %arg7[%c0_4, %c0_5] : memref<1x128xf32, #tpu.memory_space<vmem>>, vector<1x128xf32>
    %c0_6 = arith.constant 0 : index
    %c0_7 = arith.constant 0 : index
    %6 = vector.load %arg8[%c0_6, %c0_7] : memref<1x1xf32, #tpu.memory_space<vmem>>, vector<1x1xf32>
    %c0_8 = arith.constant 0 : index
    %c0_9 = arith.constant 0 : index
    %7 = vector.load %arg2[%c0_8, %c0_9] : memref<96x128xbf16, #tpu.memory_space<vmem>>, vector<96x128xbf16>
    %cst = arith.constant dense<0.000000e+00> : vector<96x128xf32>
    %8 = tpu.matmul %7, %3, %cst {dimension_numbers = #tpu.dot_dimension_numbers<[1], [0], [0], [1], [0, 0, 1, 1], [], []>} : vector<96x128xbf16>, vector<128x128xbf16>, vector<96x128xf32> -> vector<96x128xf32>
    %9 = vector.broadcast %4 : vector<1x128xf32> to vector<96x128xf32>
    %10 = arith.addf %8, %9 : vector<96x128xf32>
    %cst_10 = arith.constant 0.000000e+00 : f32
    %11 = vector.broadcast %cst_10 : f32 to vector<96x128xf32>
    %12 = arith.maximumf %10, %11 : vector<96x128xf32>
    %13 = vector.broadcast %5 : vector<1x128xf32> to vector<96x128xf32>
    %14 = arith.mulf %12, %13 : vector<96x128xf32>
    %cst_11 = arith.constant dense<0.000000e+00> : vector<96xf32>
    %15 = vector.multi_reduction <add>, %14, %cst_11 [1] : vector<96x128xf32> to vector<96xf32>
    %16 = vector.shape_cast %15 : vector<96xf32> to vector<96x1xf32>
    %17 = vector.broadcast %6 : vector<1x1xf32> to vector<96x1xf32>
    %18 = arith.addf %16, %17 : vector<96x1xf32>
    %c0_12 = arith.constant 0 : index
    %c0_13 = arith.constant 0 : index
    %19 = vector.load %arg3[%c0_12, %c0_13] : memref<96x128xbf16, #tpu.memory_space<vmem>>, vector<96x128xbf16>
    %cst_14 = arith.constant dense<0.000000e+00> : vector<96x128xf32>
    %20 = tpu.matmul %19, %3, %cst_14 {dimension_numbers = #tpu.dot_dimension_numbers<[1], [0], [0], [1], [0, 0, 1, 1], [], []>} : vector<96x128xbf16>, vector<128x128xbf16>, vector<96x128xf32> -> vector<96x128xf32>
    %21 = vector.broadcast %4 : vector<1x128xf32> to vector<96x128xf32>
    %22 = arith.addf %20, %21 : vector<96x128xf32>
    %cst_15 = arith.constant 0.000000e+00 : f32
    %23 = vector.broadcast %cst_15 : f32 to vector<96x128xf32>
    %24 = arith.maximumf %22, %23 : vector<96x128xf32>
    %25 = vector.broadcast %5 : vector<1x128xf32> to vector<96x128xf32>
    %26 = arith.mulf %24, %25 : vector<96x128xf32>
    %cst_16 = arith.constant dense<0.000000e+00> : vector<96xf32>
    %27 = vector.multi_reduction <add>, %26, %cst_16 [1] : vector<96x128xf32> to vector<96xf32>
    %28 = vector.shape_cast %27 : vector<96xf32> to vector<96x1xf32>
    %29 = vector.broadcast %6 : vector<1x1xf32> to vector<96x1xf32>
    %30 = arith.addf %28, %29 : vector<96x1xf32>
    %c0_17 = arith.constant 0 : index
    %c0_18 = arith.constant 0 : index
    %31 = vector.load %arg4[%c0_17, %c0_18] : memref<96x2xf32, #tpu.memory_space<vmem>>, vector<96x2xf32>
    %cst_19 = arith.constant 0.000000e+00 : f32
    %32 = vector.broadcast %cst_19 : f32 to vector<96x1xf32>
    %33 = arith.subf %32, %18 : vector<96x1xf32>
    %cst_20 = arith.constant 0.000000e+00 : f32
    %34 = vector.broadcast %cst_20 : f32 to vector<96x1xf32>
    %35 = arith.maximumf %33, %34 : vector<96x1xf32>
    %36 = math.absf %33 : vector<96x1xf32>
    %cst_21 = arith.constant 0.000000e+00 : f32
    %37 = vector.broadcast %cst_21 : f32 to vector<96x1xf32>
    %38 = arith.subf %37, %36 : vector<96x1xf32>
    %39 = math.exp %38 : vector<96x1xf32>
    %40 = math.log1p %39 : vector<96x1xf32>
    %41 = arith.addf %35, %40 : vector<96x1xf32>
    %cst_22 = arith.constant 1.000000e+02 : f32
    %42 = vector.broadcast %cst_22 : f32 to vector<96x1xf32>
    %43 = arith.minimumf %41, %42 : vector<96x1xf32>
    %44 = vector.extract_strided_slice %31 {offsets = [0, 0], sizes = [96, 1], strides = [1, 1]} : vector<96x2xf32> to vector<96x1xf32>
    %45 = arith.mulf %43, %44 : vector<96x1xf32>
    %cst_23 = arith.constant 0.000000e+00 : f32
    %46 = vector.broadcast %cst_23 : f32 to vector<96x1xf32>
    %47 = arith.maximumf %30, %46 : vector<96x1xf32>
    %48 = math.absf %30 : vector<96x1xf32>
    %cst_24 = arith.constant 0.000000e+00 : f32
    %49 = vector.broadcast %cst_24 : f32 to vector<96x1xf32>
    %50 = arith.subf %49, %48 : vector<96x1xf32>
    %51 = math.exp %50 : vector<96x1xf32>
    %52 = math.log1p %51 : vector<96x1xf32>
    %53 = arith.addf %47, %52 : vector<96x1xf32>
    %cst_25 = arith.constant 1.000000e+02 : f32
    %54 = vector.broadcast %cst_25 : f32 to vector<96x1xf32>
    %55 = arith.minimumf %53, %54 : vector<96x1xf32>
    %56 = vector.extract_strided_slice %31 {offsets = [0, 1], sizes = [96, 1], strides = [1, 1]} : vector<96x2xf32> to vector<96x1xf32>
    %57 = arith.mulf %55, %56 : vector<96x1xf32>
    %58 = arith.addf %45, %57 : vector<96x1xf32>
    %c0_26 = arith.constant 0 : index
    %c0_27 = arith.constant 0 : index
    %59 = vector.load %arg10[%c0_26, %c0_27] : memref<1x1xf32, #tpu.memory_space<vmem>>, vector<1x1xf32>
    %cst_28 = arith.constant dense<0.000000e+00> : vector<1xf32>
    %60 = vector.multi_reduction <add>, %58, %cst_28 [0] : vector<96x1xf32> to vector<1xf32>
    %61 = vector.shape_cast %60 : vector<1xf32> to vector<1x1xf32>
    %62 = arith.addf %59, %61 : vector<1x1xf32>
    %c0_29 = arith.constant 0 : index
    %c0_30 = arith.constant 0 : index
    %63 = vector.load %arg10[%c0_29, %c0_30] : memref<1x1xf32, #tpu.memory_space<vmem>>, vector<1x1xf32>
    tpu.vector_store %arg10[%c0_29, %c0_30], %62 {strides = array<i32>} : memref<1x1xf32, #tpu.memory_space<vmem>>, vector<1x1xf32>,
    %c0_i32_31 = arith.constant 0 : i32
    %64 = arith.cmpi eq, %arg1, %c0_i32_31 : i32
    %65 = arith.extui %64 : i1 to i32
    %c0_i32_32 = arith.constant 0 : i32
    %66 = arith.cmpi ne, %65, %c0_i32_32 : i32
    scf.if %66 {
      %c0_33 = arith.constant 0 : index
      %c0_34 = arith.constant 0 : index
      %67 = vector.load %arg10[%c0_33, %c0_34] : memref<1x1xf32, #tpu.memory_space<vmem>>, vector<1x1xf32>
      %cst_35 = arith.constant 0.00520833349 : f32
      %68 = vector.broadcast %cst_35 : f32 to vector<1x1xf32>
      %69 = arith.mulf %67, %68 : vector<1x1xf32>
      %70 = vector.shape_cast %69 : vector<1x1xf32> to vector<1x1xf32>
      %71 = vector.broadcast %70 : vector<1x1xf32> to vector<8x128xf32>
      %c0_36 = arith.constant 0 : index
      %c0_37 = arith.constant 0 : index
      %72 = vector.load %arg9[%c0_36, %c0_37] : memref<8x128xf32, #tpu.memory_space<vmem>>, vector<8x128xf32>
      tpu.vector_store %arg9[%c0_36, %c0_37], %71 {strides = array<i32>} : memref<8x128xf32, #tpu.memory_space<vmem>>, vector<8x128xf32>,
    } else {
    }
    return
  }
  func.func @transform_0(%arg0: i32, %arg1: i32) -> (i32, i32) {
    %c1_i32 = arith.constant 1 : i32
    %0 = arith.muli %arg0, %c1_i32 : i32
    %1 = arith.addi %0, %arg1 : i32
    %c0_i32 = arith.constant 0 : i32
    %c0_i32_0 = arith.constant 0 : i32
    return %1, %c0_i32 : i32, i32
  }
  func.func @transform_1(%arg0: i32, %arg1: i32) -> (i32, i32) {
    %c1_i32 = arith.constant 1 : i32
    %0 = arith.muli %arg0, %c1_i32 : i32
    %1 = arith.addi %0, %arg1 : i32
    %c0_i32 = arith.constant 0 : i32
    %c0_i32_0 = arith.constant 0 : i32
    return %1, %c0_i32 : i32, i32
  }
  func.func @transform_2(%arg0: i32, %arg1: i32) -> (i32, i32) {
    %c1_i32 = arith.constant 1 : i32
    %0 = arith.muli %arg0, %c1_i32 : i32
    %1 = arith.addi %0, %arg1 : i32
    %c0_i32 = arith.constant 0 : i32
    %c0_i32_0 = arith.constant 0 : i32
    return %1, %c0_i32 : i32, i32
  }
  func.func @transform_3(%arg0: i32, %arg1: i32) -> (i32, i32) {
    %c0_i32 = arith.constant 0 : i32
    %c0_i32_0 = arith.constant 0 : i32
    %c0_i32_1 = arith.constant 0 : i32
    return %c0_i32, %c0_i32_0 : i32, i32
  }
  func.func @transform_4(%arg0: i32, %arg1: i32) -> (i32, i32) {
    %c0_i32 = arith.constant 0 : i32
    %c0_i32_0 = arith.constant 0 : i32
    %c0_i32_1 = arith.constant 0 : i32
    return %c0_i32, %c0_i32_0 : i32, i32
  }
  func.func @transform_5(%arg0: i32, %arg1: i32) -> (i32, i32) {
    %c0_i32 = arith.constant 0 : i32
    %c0_i32_0 = arith.constant 0 : i32
    %c0_i32_1 = arith.constant 0 : i32
    return %c0_i32, %c0_i32_0 : i32, i32
  }
  func.func @transform_6(%arg0: i32, %arg1: i32) -> (i32, i32) {
    %c0_i32 = arith.constant 0 : i32
    %c0_i32_0 = arith.constant 0 : i32
    %c0_i32_1 = arith.constant 0 : i32
    return %c0_i32, %c0_i32_0 : i32, i32
  }
  func.func @transform_7(%arg0: i32, %arg1: i32) -> (i32, i32) {
    %c0_i32 = arith.constant 0 : i32
    %c0_i32_0 = arith.constant 0 : i32
    return %arg0, %c0_i32 : i32, i32
  }
}

module attributes {stable_mosaic.version = 11 : i64} {
  func.func @dann_loss_kernel(%arg0: i32, %arg1: i32, %arg2: memref<96x128xbf16, #tpu.memory_space<vmem>>, %arg3: memref<96x128xbf16, #tpu.memory_space<vmem>>, %arg4: memref<96x2xf32, #tpu.memory_space<vmem>>, %arg5: memref<128x128xbf16, #tpu.memory_space<vmem>>, %arg6: memref<1x128xf32, #tpu.memory_space<vmem>>, %arg7: memref<1x128xf32, #tpu.memory_space<vmem>>, %arg8: memref<1x1xf32, #tpu.memory_space<vmem>>, %arg9: memref<8x128xf32, #tpu.memory_space<vmem>>, %arg10: memref<1x1xf32, #tpu.memory_space<vmem>>) attributes {dimension_semantics = [#tpu.dimension_semantics<parallel>, #tpu.dimension_semantics<arbitrary>], iteration_bounds = array<i64: 1, 1>, scalar_prefetch = 0 : i64, scratch_operands = 1 : i64, tpu.core_type = #tpu.core_type<tc>, window_params = [{transform_indices = @transform_0, window_bounds = array<i64: 96, 128>}, {transform_indices = @transform_1, window_bounds = array<i64: 96, 128>}, {transform_indices = @transform_2, window_bounds = array<i64: 96, 2>}, {pipeline_mode = #tpu.pipeline_mode<synchronous>, transform_indices = @transform_3, window_bounds = array<i64: 128, 128>}, {pipeline_mode = #tpu.pipeline_mode<synchronous>, transform_indices = @transform_4, window_bounds = array<i64: 1, 128>}, {pipeline_mode = #tpu.pipeline_mode<synchronous>, transform_indices = @transform_5, window_bounds = array<i64: 1, 128>}, {pipeline_mode = #tpu.pipeline_mode<synchronous>, transform_indices = @transform_6, window_bounds = array<i64: 1, 1>}, {transform_indices = @transform_7, window_bounds = array<i64: 8, 128>}]} {
    %c0_i32 = arith.constant 0 : i32
    %0 = arith.cmpi eq, %arg1, %c0_i32 : i32
    %1 = arith.extui %0 : i1 to i32
    %c0_i32_0 = arith.constant 0 : i32
    %2 = arith.cmpi ne, %1, %c0_i32_0 : i32
    scf.if %2 {
      %cst_33 = arith.constant 0.000000e+00 : f32
      %67 = vector.broadcast %cst_33 : f32 to vector<1x1xf32>
      %c0_34 = arith.constant 0 : index
      %c0_35 = arith.constant 0 : index
      %68 = vector.load %arg10[%c0_34, %c0_35] : memref<1x1xf32, #tpu.memory_space<vmem>>, vector<1x1xf32>
      tpu.vector_store %arg10[%c0_34, %c0_35], %67 {strides = array<i32>} : memref<1x1xf32, #tpu.memory_space<vmem>>, vector<1x1xf32>,
    } else {
    }
    %c0 = arith.constant 0 : index
    %c0_1 = arith.constant 0 : index
    %3 = vector.load %arg5[%c0, %c0_1] : memref<128x128xbf16, #tpu.memory_space<vmem>>, vector<128x128xbf16>
    %c0_2 = arith.constant 0 : index
    %c0_3 = arith.constant 0 : index
    %4 = vector.load %arg6[%c0_2, %c0_3] : memref<1x128xf32, #tpu.memory_space<vmem>>, vector<1x128xf32>
    %c0_4 = arith.constant 0 : index
    %c0_5 = arith.constant 0 : index
    %5 = vector.load %arg7[%c0_4, %c0_5] : memref<1x128xf32, #tpu.memory_space<vmem>>, vector<1x128xf32>
    %c0_6 = arith.constant 0 : index
    %c0_7 = arith.constant 0 : index
    %6 = vector.load %arg8[%c0_6, %c0_7] : memref<1x1xf32, #tpu.memory_space<vmem>>, vector<1x1xf32>
    %c0_8 = arith.constant 0 : index
    %c0_9 = arith.constant 0 : index
    %7 = vector.load %arg2[%c0_8, %c0_9] : memref<96x128xbf16, #tpu.memory_space<vmem>>, vector<96x128xbf16>
    %cst = arith.constant dense<0.000000e+00> : vector<96x128xf32>
    %8 = tpu.matmul %7, %3, %cst {dimension_numbers = #tpu.dot_dimension_numbers<[1], [0], [0], [1], [0, 0, 1, 1], [], []>} : vector<96x128xbf16>, vector<128x128xbf16>, vector<96x128xf32> -> vector<96x128xf32>
    %9 = vector.broadcast %4 : vector<1x128xf32> to vector<96x128xf32>
    %10 = arith.addf %8, %9 : vector<96x128xf32>
    %cst_10 = arith.constant 0.000000e+00 : f32
    %11 = vector.broadcast %cst_10 : f32 to vector<96x128xf32>
    %12 = arith.maximumf %10, %11 : vector<96x128xf32>
    %13 = vector.broadcast %5 : vector<1x128xf32> to vector<96x128xf32>
    %14 = arith.mulf %12, %13 : vector<96x128xf32>
    %cst_11 = arith.constant dense<0.000000e+00> : vector<96xf32>
    %15 = vector.multi_reduction <add>, %14, %cst_11 [1] : vector<96x128xf32> to vector<96xf32>
    %16 = vector.shape_cast %15 : vector<96xf32> to vector<96x1xf32>
    %17 = vector.broadcast %6 : vector<1x1xf32> to vector<96x1xf32>
    %18 = arith.addf %16, %17 : vector<96x1xf32>
    %c0_12 = arith.constant 0 : index
    %c0_13 = arith.constant 0 : index
    %19 = vector.load %arg3[%c0_12, %c0_13] : memref<96x128xbf16, #tpu.memory_space<vmem>>, vector<96x128xbf16>
    %cst_14 = arith.constant dense<0.000000e+00> : vector<96x128xf32>
    %20 = tpu.matmul %19, %3, %cst_14 {dimension_numbers = #tpu.dot_dimension_numbers<[1], [0], [0], [1], [0, 0, 1, 1], [], []>} : vector<96x128xbf16>, vector<128x128xbf16>, vector<96x128xf32> -> vector<96x128xf32>
    %21 = vector.broadcast %4 : vector<1x128xf32> to vector<96x128xf32>
    %22 = arith.addf %20, %21 : vector<96x128xf32>
    %cst_15 = arith.constant 0.000000e+00 : f32
    %23 = vector.broadcast %cst_15 : f32 to vector<96x128xf32>
    %24 = arith.maximumf %22, %23 : vector<96x128xf32>
    %25 = vector.broadcast %5 : vector<1x128xf32> to vector<96x128xf32>
    %26 = arith.mulf %24, %25 : vector<96x128xf32>
    %cst_16 = arith.constant dense<0.000000e+00> : vector<96xf32>
    %27 = vector.multi_reduction <add>, %26, %cst_16 [1] : vector<96x128xf32> to vector<96xf32>
    %28 = vector.shape_cast %27 : vector<96xf32> to vector<96x1xf32>
    %29 = vector.broadcast %6 : vector<1x1xf32> to vector<96x1xf32>
    %30 = arith.addf %28, %29 : vector<96x1xf32>
    %c0_17 = arith.constant 0 : index
    %c0_18 = arith.constant 0 : index
    %31 = vector.load %arg4[%c0_17, %c0_18] : memref<96x2xf32, #tpu.memory_space<vmem>>, vector<96x2xf32>
    %cst_19 = arith.constant 0.000000e+00 : f32
    %32 = vector.broadcast %cst_19 : f32 to vector<96x1xf32>
    %33 = arith.subf %32, %18 : vector<96x1xf32>
    %cst_20 = arith.constant 0.000000e+00 : f32
    %34 = vector.broadcast %cst_20 : f32 to vector<96x1xf32>
    %35 = arith.maximumf %33, %34 : vector<96x1xf32>
    %36 = math.absf %33 : vector<96x1xf32>
    %cst_21 = arith.constant 0.000000e+00 : f32
    %37 = vector.broadcast %cst_21 : f32 to vector<96x1xf32>
    %38 = arith.subf %37, %36 : vector<96x1xf32>
    %39 = math.exp %38 : vector<96x1xf32>
    %40 = math.log1p %39 : vector<96x1xf32>
    %41 = arith.addf %35, %40 : vector<96x1xf32>
    %cst_22 = arith.constant 1.000000e+02 : f32
    %42 = vector.broadcast %cst_22 : f32 to vector<96x1xf32>
    %43 = arith.minimumf %41, %42 : vector<96x1xf32>
    %44 = vector.extract_strided_slice %31 {offsets = [0, 0], sizes = [96, 1], strides = [1, 1]} : vector<96x2xf32> to vector<96x1xf32>
    %45 = arith.mulf %43, %44 : vector<96x1xf32>
    %cst_23 = arith.constant 0.000000e+00 : f32
    %46 = vector.broadcast %cst_23 : f32 to vector<96x1xf32>
    %47 = arith.maximumf %30, %46 : vector<96x1xf32>
    %48 = math.absf %30 : vector<96x1xf32>
    %cst_24 = arith.constant 0.000000e+00 : f32
    %49 = vector.broadcast %cst_24 : f32 to vector<96x1xf32>
    %50 = arith.subf %49, %48 : vector<96x1xf32>
    %51 = math.exp %50 : vector<96x1xf32>
    %52 = math.log1p %51 : vector<96x1xf32>
    %53 = arith.addf %47, %52 : vector<96x1xf32>
    %cst_25 = arith.constant 1.000000e+02 : f32
    %54 = vector.broadcast %cst_25 : f32 to vector<96x1xf32>
    %55 = arith.minimumf %53, %54 : vector<96x1xf32>
    %56 = vector.extract_strided_slice %31 {offsets = [0, 1], sizes = [96, 1], strides = [1, 1]} : vector<96x2xf32> to vector<96x1xf32>
    %57 = arith.mulf %55, %56 : vector<96x1xf32>
    %58 = arith.addf %45, %57 : vector<96x1xf32>
    %c0_26 = arith.constant 0 : index
    %c0_27 = arith.constant 0 : index
    %59 = vector.load %arg10[%c0_26, %c0_27] : memref<1x1xf32, #tpu.memory_space<vmem>>, vector<1x1xf32>
    %cst_28 = arith.constant dense<0.000000e+00> : vector<1xf32>
    %60 = vector.multi_reduction <add>, %58, %cst_28 [0] : vector<96x1xf32> to vector<1xf32>
    %61 = vector.shape_cast %60 : vector<1xf32> to vector<1x1xf32>
    %62 = arith.addf %59, %61 : vector<1x1xf32>
    %c0_29 = arith.constant 0 : index
    %c0_30 = arith.constant 0 : index
    %63 = vector.load %arg10[%c0_29, %c0_30] : memref<1x1xf32, #tpu.memory_space<vmem>>, vector<1x1xf32>
    tpu.vector_store %arg10[%c0_29, %c0_30], %62 {strides = array<i32>} : memref<1x1xf32, #tpu.memory_space<vmem>>, vector<1x1xf32>,
    %c0_i32_31 = arith.constant 0 : i32
    %64 = arith.cmpi eq, %arg1, %c0_i32_31 : i32
    %65 = arith.extui %64 : i1 to i32
    %c0_i32_32 = arith.constant 0 : i32
    %66 = arith.cmpi ne, %65, %c0_i32_32 : i32
    scf.if %66 {
      %c0_33 = arith.constant 0 : index
      %c0_34 = arith.constant 0 : index
      %67 = vector.load %arg10[%c0_33, %c0_34] : memref<1x1xf32, #tpu.memory_space<vmem>>, vector<1x1xf32>
      %cst_35 = arith.constant 0.00520833349 : f32
      %68 = vector.broadcast %cst_35 : f32 to vector<1x1xf32>
      %69 = arith.mulf %67, %68 : vector<1x1xf32>
      %70 = vector.shape_cast %69 : vector<1x1xf32> to vector<1x1xf32>
      %71 = vector.broadcast %70 : vector<1x1xf32> to vector<8x128xf32>
      %c0_36 = arith.constant 0 : index
      %c0_37 = arith.constant 0 : index
      %72 = vector.load %arg9[%c0_36, %c0_37] : memref<8x128xf32, #tpu.memory_space<vmem>>, vector<8x128xf32>
      tpu.vector_store %arg9[%c0_36, %c0_37], %71 {strides = array<i32>} : memref<8x128xf32, #tpu.memory_space<vmem>>, vector<8x128xf32>,
    } else {
    }
    return
  }
  func.func @transform_0(%arg0: i32, %arg1: i32) -> (i32, i32) {
    %c1_i32 = arith.constant 1 : i32
    %0 = arith.muli %arg0, %c1_i32 : i32
    %1 = arith.addi %0, %arg1 : i32
    %c0_i32 = arith.constant 0 : i32
    %c0_i32_0 = arith.constant 0 : i32
    return %1, %c0_i32 : i32, i32
  }
  func.func @transform_1(%arg0: i32, %arg1: i32) -> (i32, i32) {
    %c1_i32 = arith.constant 1 : i32
    %0 = arith.muli %arg0, %c1_i32 : i32
    %1 = arith.addi %0, %arg1 : i32
    %c0_i32 = arith.constant 0 : i32
    %c0_i32_0 = arith.constant 0 : i32
    return %1, %c0_i32 : i32, i32
  }
  func.func @transform_2(%arg0: i32, %arg1: i32) -> (i32, i32) {
    %c1_i32 = arith.constant 1 : i32
    %0 = arith.muli %arg0, %c1_i32 : i32
    %1 = arith.addi %0, %arg1 : i32
    %c0_i32 = arith.constant 0 : i32
    %c0_i32_0 = arith.constant 0 : i32
    return %1, %c0_i32 : i32, i32
  }
  func.func @transform_3(%arg0: i32, %arg1: i32) -> (i32, i32) {
    %c0_i32 = arith.constant 0 : i32
    %c0_i32_0 = arith.constant 0 : i32
    %c0_i32_1 = arith.constant 0 : i32
    return %c0_i32, %c0_i32_0 : i32, i32
  }
  func.func @transform_4(%arg0: i32, %arg1: i32) -> (i32, i32) {
    %c0_i32 = arith.constant 0 : i32
    %c0_i32_0 = arith.constant 0 : i32
    %c0_i32_1 = arith.constant 0 : i32
    return %c0_i32, %c0_i32_0 : i32, i32
  }
  func.func @transform_5(%arg0: i32, %arg1: i32) -> (i32, i32) {
    %c0_i32 = arith.constant 0 : i32
    %c0_i32_0 = arith.constant 0 : i32
    %c0_i32_1 = arith.constant 0 : i32
    return %c0_i32, %c0_i32_0 : i32, i32
  }
  func.func @transform_6(%arg0: i32, %arg1: i32) -> (i32, i32) {
    %c0_i32 = arith.constant 0 : i32
    %c0_i32_0 = arith.constant 0 : i32
    %c0_i32_1 = arith.constant 0 : i32
    return %c0_i32, %c0_i32_0 : i32, i32
  }
  func.func @transform_7(%arg0: i32, %arg1: i32) -> (i32, i32) {
    %c0_i32 = arith.constant 0 : i32
    %c0_i32_0 = arith.constant 0 : i32
    return %arg0, %c0_i32 : i32, i32
  }
}

</mosaic_0001>

<bundles_post_ra>
// kernel: tpu_custom_call.1
= control target key start
LH: loop header
LB: loop body
LE: loop exit
PB: predicated region body
PF: predicated region fallthrough
CT: control target
= control target key end

     0   :  { %s1998_s0 = inlined_call_operand.hbm [shape: bf16[96,128], index: 0, kind: input, shape index: {}]   ;;  %s1999_s1 = inlined_call_operand.hbm [shape: bf16[96,128], index: 1, kind: input, shape index: {}]   ;;  %s2000_s2 = inlined_call_operand.vmem [shape: f32[96,2], index: 2, kind: input, shape index: {}]   ;;  %s2001_s3 = inlined_call_operand.vmem [shape: bf16[128,128], index: 3, kind: input, shape index: {}]   ;;  %s2002_s4 = inlined_call_operand.vmem [shape: f32[1,128], index: 4, kind: input, shape index: {}]   ;;  %s2003_s5 = inlined_call_operand.vmem [shape: f32[1,128], index: 5, kind: input, shape index: {}]   ;;  %s2004_s6 = inlined_call_operand.<no memory space> [shape: f32[1,1], index: 6, kind: input, shape index: {}]   ;;  %s2005_s7 = inlined_call_operand.hbm [shape: f32[8,128], index: 7, kind: output, shape index: {}]  }
   0x1   :  { %v12_v0 = vstv %s2004_s6 }
   0x2   :  { %13 = vst [vmem:[#allocation3] sm:$0x1] %v12_v0 }
   0x3   :  { %14 = vsyncpa [#allocation5], 0 }
   0x4   :  { %15 = vsyncpa [#allocation8], 0 }
   0x5   :  { %16 = vsyncpa [#allocation6], 0  ;;  %s25_s28 = sshll.u32 %s1998_s0, 4  ;;  %s1342_s29 = smov [#allocation4]   ;;  %s26_s28 = int_to_ptr.hbm [resolvable:$true] %s25_s28 }
   0x6   :  { %s27_s30 = sshll.u32 %s1342_s29, 4  ;;  %s42_s10 = sshll.u32 %s1999_s1, 4  ;;  %s28_s30 = int_to_ptr.vmem [resolvable:$true] %s27_s30  ;;  %s43_s10 = int_to_ptr.hbm [resolvable:$true] %s42_s10 }
   0x7   :  { %s1343_s11 = smov 64   ;;  %s1344_s12 = smov 4  }
   0x8   :  { %33 = dma.hbm_to_vmem [thread:$0]  %s26_s28, 768, %s28_s30, [#allocation5], %s1343_s11, %s1343_s11, %s1344_s12  }
   0x9   :  { %s1345_s6 = smov [#allocation7]  }
   0xa   :  { %s44_s13 = sshll.u32 %s1345_s6, 4  ;;  %s45_s13 = int_to_ptr.vmem [resolvable:$true] %s44_s13 }
   0xb   :  { %50 = dma.hbm_to_vmem [thread:$0]  %s43_s10, 768, %s45_s13, [#allocation8], %s1343_s11, %s1343_s11, %s1344_s12  }
   0xc   :  { %1336 = dma.done.wait [#allocation5], 768  }
   0xd   :  { %1337 = vsyncadd [#allocation5], 4294966528 }
   0xe   :  { %1338 = dma.done.wait [#allocation8], 768  }
   0xf   :  { %1339 = vsyncadd [#allocation8], 4294966528  ;;  %v1120_v1 = vld [vmem:[%s2001_s3 + $0x38] sm:$0xff]  ;;  %v1119_v2 = vld [vmem:[%s2001_s3 + $0x30] sm:$0xff]  ;;  %vm964_vm2 = vcmask 7168   ;;  %s1016_s18 = sshll.u32 %s2005_s7, 4  ;;  %s1017_s18 = int_to_ptr.hbm [resolvable:$true] %s1016_s18 }
  0x10   :  { %219 = vmatpush.bf16.msra.mxu0 %v1120_v1  ;;  %1133 = vmatpush.bf16.msra.mxu2 %v1120_v1  ;;  %v1118_v3 = vld [vmem:[%s2001_s3 + $0x28] sm:$0xff]  ;;  %v1117_v4 = vld [vmem:[%s2001_s3 + $0x20] sm:$0xff]  ;;  %v1116_v5 = vld [vmem:[%s2001_s3 + $0x18] sm:$0xff] }
  0x11   :  { %372 = vmatpush.bf16.msra.mxu1 %v1120_v1  ;;  %1141 = vmatpush.bf16.msra.mxu3 %v1120_v1  ;;  %v1115_v6 = vld [vmem:[%s2001_s3 + $0x10] sm:$0xff]  ;;  %v1114_v7 = vld [vmem:[%s2001_s3 + $0x8] sm:$0xff]  ;;  %v1113_v8 = vld [vmem:[%s2001_s3] sm:$0xff]  ;;  %s1346_s3 = smov 127  }
  0x12   :  { %v1121_v9 = vld [vmem:[#allocation4] sm:$0xff]  ;;  %v1124_v10 = vld [vmem:[#allocation4 + $0x18] sm:$0xff]  ;;  %v1127_v11 = vld [vmem:[#allocation7] sm:$0xff] }
  0x13   :  { %v1130_v12 = vld [vmem:[#allocation7 + $0x18] sm:$0xff]  ;;  %v1433_v14 = vld [vmem:[%s2000_s2] sm:$0xff]  ;;  %v474_v17 = vld [vmem:[%s2000_s2 + $0x18] sm:$0xff] }
  0x14   :  { %220 = vmatpush.bf16.msra.mxu0 %v1119_v2  ;;  %1134 = vmatpush.bf16.msra.mxu2 %v1119_v2  ;;  %v1426_v13 = vld [vmem:[%s2000_s2 + $0x8] sm:$0xff]  ;;  %v473_v15 = vld [vmem:[%s2000_s2 + $0x10] sm:$0xff]  ;;  %v475_v18 = vld [vmem:[%s2000_s2 + $0x20] sm:$0xff] }
  0x15   :  { %373 = vmatpush.bf16.msra.mxu1 %v1119_v2  ;;  %1142 = vmatpush.bf16.msra.mxu3 %v1119_v2  ;;  %v476_v16 = vld [vmem:[%s2000_s2 + $0x28] sm:$0xff]  ;;  %v1128_v21 = vld [vmem:[#allocation7 + $0x8] sm:$0xff]  ;;  %v1131_v22 = vld [vmem:[#allocation7 + $0x20] sm:$0xff] }
  0x16   :  { %905 = vrot.lane.b32.xlu1 %v1426_v13, %s1346_s3  ;;  %903 = vrot.lane.b32.xlu0 %v1433_v14, %s1346_s3  ;;  %v1122_v19 = vld [vmem:[#allocation4 + $0x8] sm:$0xff]  ;;  %v1125_v20 = vld [vmem:[#allocation4 + $0x20] sm:$0xff]  ;;  %v1466_v25 = vld [vmem:[%s2000_s2 + $0x38] sm:$0xff] }
  0x17   :  { %907 = vrot.lane.b32.xlu2 %v473_v15, %s1346_s3  ;;  %v1456_v23 = vld [vmem:[%s2000_s2 + $0x40] sm:$0xff]  ;;  %v1461_v24 = vld [vmem:[%s2000_s2 + $0x30] sm:$0xff] }
  0x18   :  { %221 = vmatpush.bf16.msra.mxu0 %v1118_v3  ;;  %1135 = vmatpush.bf16.msra.mxu2 %v1118_v3  ;;  %v1123_v26 = vld [vmem:[#allocation4 + $0x10] sm:$0xff]  ;;  %v1126_v27 = vld [vmem:[#allocation4 + $0x28] sm:$0xff]  ;;  %v1129_v28 = vld [vmem:[#allocation7 + $0x10] sm:$0xff] }
  0x19   :  { %374 = vmatpush.bf16.msra.mxu1 %v1118_v3  ;;  %1143 = vmatpush.bf16.msra.mxu3 %v1118_v3  ;;  %v1132_v29 = vld [vmem:[#allocation7 + $0x28] sm:$0xff] }
  0x1a   :  { %v1477_v30 = vld [vmem:[%s2002_s4] ss:$0 sm:$0xff] }
  0x1b   :  { %v1483_v34 = vld [vmem:[%s2003_s5] ss:$0 sm:$0xff] }
  0x1c   :  { %222 = vmatpush.bf16.msra.mxu0 %v1117_v4  ;;  %1136 = vmatpush.bf16.msra.mxu2 %v1117_v4 }
  0x1d   :  { %375 = vmatpush.bf16.msra.mxu1 %v1117_v4  ;;  %1144 = vmatpush.bf16.msra.mxu3 %v1117_v4 }
  0x1e   :  { %913 = vrot.lane.b32.xlu1 %v476_v16, %s1346_s3  ;;  %909 = vrot.lane.b32.xlu0 %v474_v17, %s1346_s3 }
  0x1f   :  { %911 = vrot.lane.b32.xlu2 %v475_v18, %s1346_s3 }
  0x20   :  { %223 = vmatpush.bf16.msra.mxu0 %v1116_v5  ;;  %1137 = vmatpush.bf16.msra.mxu2 %v1116_v5 }
  0x21   :  { %376 = vmatpush.bf16.msra.mxu1 %v1116_v5  ;;  %1145 = vmatpush.bf16.msra.mxu3 %v1116_v5 }
  0x24   :  { %224 = vmatpush.bf16.msra.mxu0 %v1115_v6  ;;  %1138 = vmatpush.bf16.msra.mxu2 %v1115_v6 }
  0x25   :  { %377 = vmatpush.bf16.msra.mxu1 %v1115_v6  ;;  %1146 = vmatpush.bf16.msra.mxu3 %v1115_v6 }
  0x26   :  { %919 = vrot.lane.b32.xlu1 %v1456_v23, %s1346_s3  ;;  %915 = vrot.lane.b32.xlu0 %v1461_v24, %s1346_s3 }
  0x27   :  { %917 = vrot.lane.b32.xlu2 %v1466_v25, %s1346_s3 }
  0x28   :  { %225 = vmatpush.bf16.msra.mxu0 %v1114_v7  ;;  %1139 = vmatpush.bf16.msra.mxu2 %v1114_v7 }
  0x29   :  { %378 = vmatpush.bf16.msra.mxu1 %v1114_v7  ;;  %1147 = vmatpush.bf16.msra.mxu3 %v1114_v7 }
  0x2c   :  { %226 = vmatpush.bf16.msra.mxu0 %v1113_v8  ;;  %1140 = vmatpush.bf16.msra.mxu2 %v1113_v8 }
  0x2d   :  { %379 = vmatpush.bf16.msra.mxu1 %v1113_v8  ;;  %1148 = vmatpush.bf16.msra.mxu3 %v1113_v8 }
  0x2f   :  { %227 = vmatmul.bf16.vlgmr.msra.gmra.mxu0 %v1121_v9  ;;  %242 = vmatmul.bf16.vlgmr.msra.gmra.mxu2 %v1124_v10 }
  0x30   :  { %380 = vmatmul.bf16.vlgmr.msra.gmra.mxu1 %v1127_v11  ;;  %395 = vmatmul.bf16.vlgmr.msra.gmra.mxu3 %v1130_v12 }
  0x3f   :  { %232 = vmatmul.bf16.gmra.mxu0 %v1122_v19  ;;  %247 = vmatmul.bf16.gmra.mxu2 %v1125_v20 }
  0x40   :  { %385 = vmatmul.bf16.gmra.mxu1 %v1128_v21  ;;  %400 = vmatmul.bf16.gmra.mxu3 %v1131_v22 }
  0x4f   :  { %237 = vmatmul.bf16.gmra.mxu0 %v1123_v26  ;;  %252 = vmatmul.bf16.gmra.mxu2 %v1126_v27 }
  0x50   :  { %390 = vmatmul.bf16.gmra.mxu1 %v1129_v28  ;;  %405 = vmatmul.bf16.gmra.mxu3 %v1132_v29 }
  0xac   :  { %v228_v31 = vpop.f32.mrf.mxu0 }
  0xad   :  { %v229_v32 = vadd.f32 %v1477_v30, %v228_v31  ;;  %v381_v33 = vpop.f32.mrf.mxu1 }
  0xae   :  { %v382_v35 = vadd.f32 %v1477_v30, %v381_v33 }
  0xaf   :  { %v258_v36 = vmax.f32 %v229_v32, 0.0 }
  0xb0   :  { %v411_v37 = vmax.f32 %v382_v35, 0.0 }
  0xb1   :  { %v273_v38 = vmul.f32 %v1483_v34, %v258_v36 }
  0xb2   :  { %v243_v39 = vpop.f32.mrf.mxu2  ;;  %v423_v40 = vmul.f32 %v1483_v34, %v411_v37 }
  0xb3   :  { %v244_v41 = vadd.f32 %v1477_v30, %v243_v39  ;;  %v396_v42 = vpop.f32.mrf.mxu3  ;;  %285 = vadd.xlane.f32.xlu0 %v273_v38 }
  0xb4   :  { %435 = vadd.xlane.f32.xlu1 %v423_v40  ;;  %v230_v43 = vpop.f32.mrf.mxu0  ;;  %v397_v45 = vadd.f32 %v1477_v30, %v396_v42 }
  0xb5   :  { %v264_v44 = vmax.f32 %v244_v41, 0.0  ;;  %v231_v46 = vadd.f32 %v1477_v30, %v230_v43  ;;  %v383_v47 = vpop.f32.mrf.mxu1 }
  0xb6   :  { %v417_v50 = vmax.f32 %v397_v45, 0.0  ;;  %v384_v60 = vadd.f32 %v1477_v30, %v383_v47 }
  0xb7   :  { %v259_v48 = vmax.f32 %v231_v46, 0.0  ;;  %v279_v49 = vmul.f32 %v1483_v34, %v264_v44 }
  0xb8   :  { %v429_v58 = vmul.f32 %v1483_v34, %v417_v50  ;;  %v412_v2 = vmax.f32 %v384_v60, 0.0 }
  0xb9   :  { %297 = vadd.xlane.f32.xlu2 %v279_v49  ;;  %v274_v51 = vmul.f32 %v1483_v34, %v259_v48 }
  0xba   :  { %v245_v52 = vpop.f32.mrf.mxu2  ;;  %v424_v12 = vmul.f32 %v1483_v34, %v412_v2 }
  0xbb   :  { %v246_v53 = vadd.f32 %v1477_v30, %v245_v52  ;;  %287 = vadd.xlane.f32.xlu0 %v274_v51  ;;  %v398_v54 = vpop.f32.mrf.mxu3 }
  0xbc   :  { %v233_v55 = vpop.f32.mrf.mxu0  ;;  %v399_v61 = vadd.f32 %v1477_v30, %v398_v54 }
  0xbd   :  { %v265_v56 = vmax.f32 %v246_v53, 0.0  ;;  %v386_v57 = vpop.f32.mrf.mxu1  ;;  %v234_v8 = vadd.f32 %v1477_v30, %v233_v55 }
  0xbe   :  { %v387_v59 = vadd.f32 %v1477_v30, %v386_v57  ;;  %v418_v3 = vmax.f32 %v399_v61, 0.0 }
  0xbf   :  { %v280_v62 = vmul.f32 %v1483_v34, %v265_v56  ;;  %v260_v17 = vmax.f32 %v234_v8, 0.0  ;;  %v481_v8 = vld [vmem:[%s2000_s2 + $0x50] sm:$0xff] }
  0xc0   :  { %v413_v63 = vmax.f32 %v387_v59, 0.0  ;;  %v430_v11 = vmul.f32 %v1483_v34, %v418_v3 }
  0xc1   :  { %299 = vadd.xlane.f32.xlu1 %v280_v62  ;;  %447 = vadd.xlane.f32.xlu2 %v429_v58  ;;  %v275_v29 = vmul.f32 %v1483_v34, %v260_v17 }
  0xc2   :  { %v248_v0 = vpop.f32.mrf.mxu2  ;;  %v425_v1 = vmul.f32 %v1483_v34, %v413_v63 }
  0xc3   :  { %v249_v4 = vadd.f32 %v1477_v30, %v248_v0  ;;  %v401_v10 = vpop.f32.mrf.mxu3 }
  0xc4   :  { %439 = vadd.xlane.f32.xlu0 %v425_v1  ;;  %v235_v5 = vpop.f32.mrf.mxu0  ;;  %v402_v15 = vadd.f32 %v1477_v30, %v401_v10  ;;  %v1548_v10 = vpop.permute.xlu2 %907 }
  0xc5   :  { %v266_v6 = vmax.f32 %v249_v4, 0.0  ;;  %v388_v7 = vpop.f32.mrf.mxu1  ;;  %v236_v9 = vadd.f32 %v1477_v30, %v235_v5 }
  0xc6   :  { %v419_v19 = vmax.f32 %v402_v15, 0.0  ;;  %v389_v26 = vadd.f32 %v1477_v30, %v388_v7  ;;  %v480_v7 = vld [vmem:[%s2000_s2 + $0x48] sm:$0xff] }
  0xc7   :  { %v281_v16 = vmul.f32 %v1483_v34, %v266_v6  ;;  %v261_v18 = vmax.f32 %v236_v9, 0.0  ;;  %v1542_v9 = vpop.permute.xlu0 %903 }
  0xc8   :  { %v431_v31 = vmul.f32 %v1483_v34, %v419_v19  ;;  %v414_v32 = vmax.f32 %v389_v26, 0.0 }
  0xc9   :  { %449 = vadd.xlane.f32.xlu1 %v430_v11  ;;  %437 = vadd.xlane.f32.xlu2 %v424_v12  ;;  %v276_v28 = vmul.f32 %v1483_v34, %v261_v18  ;;  %v1560_v18 = vld [vmem:[#allocation3] ss:$0 sm:$0xff] }
  0xca   :  { %v250_v21 = vpop.f32.mrf.mxu2  ;;  %v426_v39 = vmul.f32 %v1483_v34, %v414_v32 }
  0xcb   :  { %v403_v33 = vpop.f32.mrf.mxu3  ;;  %v251_v40 = vadd.f32 %v1477_v30, %v250_v21 }
  0xcc   :  { %301 = vadd.xlane.f32.xlu0 %v281_v16  ;;  %v238_v20 = vpop.f32.mrf.mxu0  ;;  %v404_v52 = vadd.f32 %v1477_v30, %v403_v33  ;;  %v1554_v15 = vpop.permute.xlu2 %911 }
  0xcd   :  { %v391_v22 = vpop.f32.mrf.mxu1  ;;  %v239_v27 = vadd.f32 %v1477_v30, %v238_v20  ;;  %v267_v48 = vmax.f32 %v251_v40, 0.0 }
  0xce   :  { %v392_v41 = vadd.f32 %v1477_v30, %v391_v22  ;;  %v420_v59 = vmax.f32 %v404_v52, 0.0 }
  0xcf   :  { %v262_v35 = vmax.f32 %v239_v27, 0.0  ;;  %v282_v53 = vmul.f32 %v1483_v34, %v267_v48  ;;  %v1550_v11 = vpop.permute.xlu0 %909 }
  0xd0   :  { %v415_v49 = vmax.f32 %v392_v41, 0.0  ;;  %v432_v1 = vmul.f32 %v1483_v34, %v420_v59 }
  0xd1   :  { %291 = vadd.xlane.f32.xlu2 %v276_v28  ;;  %289 = vadd.xlane.f32.xlu1 %v275_v29  ;;  %v277_v44 = vmul.f32 %v1483_v34, %v262_v35 }
  0xd2   :  { %v253_v38 = vpop.f32.mrf.mxu2  ;;  %v427_v54 = vmul.f32 %v1483_v34, %v415_v49 }
  0xd3   :  { %v406_v47 = vpop.f32.mrf.mxu3  ;;  %v254_v50 = vadd.f32 %v1477_v30, %v253_v38 }
  0xd4   :  { %451 = vadd.xlane.f32.xlu0 %v431_v31  ;;  %v240_v36 = vpop.f32.mrf.mxu0  ;;  %v407_v63 = vadd.f32 %v1477_v30, %v406_v47  ;;  %v1562_v19 = vpop.permute.xlu2 %917 }
  0xd5   :  { %v241_v37 = vadd.f32 %v1477_v30, %v240_v36  ;;  %v393_v43 = vpop.f32.mrf.mxu1  ;;  %v268_v56 = vmax.f32 %v254_v50, 0.0 }
  0xd6   :  { %v394_v46 = vadd.f32 %v1477_v30, %v393_v43  ;;  %v421_v3 = vmax.f32 %v407_v63, 0.0 }
  0xd7   :  { %v263_v42 = vmax.f32 %v241_v37, 0.0  ;;  %v283_v61 = vmul.f32 %v1483_v34, %v268_v56  ;;  %v1556_v16 = vpop.permute.xlu0 %915 }
  0xd8   :  { %v416_v51 = vmax.f32 %v394_v46, 0.0  ;;  %v433_v6 = vmul.f32 %v1483_v34, %v421_v3 }
  0xd9   :  { %441 = vadd.xlane.f32.xlu2 %v426_v39  ;;  %293 = vadd.xlane.f32.xlu1 %v277_v44  ;;  %v278_v45 = vmul.f32 %v1483_v34, %v263_v42 }
  0xda   :  { %v255_v55 = vpop.f32.mrf.mxu2  ;;  %v428_v58 = vmul.f32 %v1483_v34, %v416_v51 }
  0xdb   :  { %v256_v57 = vadd.f32 %v1477_v30, %v255_v55  ;;  %v408_v60 = vpop.f32.mrf.mxu3 }
  0xdc   :  { %295 = vadd.xlane.f32.xlu0 %v278_v45  ;;  %v409_v0 = vadd.f32 %v1477_v30, %v408_v60  ;;  %v482_v30 = vld [vmem:[%s2000_s2 + $0x58] sm:$0xff] }
  0xdd   :  { %v269_v62 = vmax.f32 %v256_v57, 0.0 }
  0xde   :  { %v422_v4 = vmax.f32 %v409_v0, 0.0 }
  0xdf   :  { %v284_v2 = vmul.f32 %v1483_v34, %v269_v62 }
  0xe0   :  { %v434_v5 = vmul.f32 %v1483_v34, %v422_v4  ;;  %v1546_v34 = vpop.permute.xlu1 %905 }
  0xe1   :  { %303 = vadd.xlane.f32.xlu2 %v282_v53  ;;  %443 = vadd.xlane.f32.xlu1 %v427_v54 }
  0xe4   :  { %445 = vadd.xlane.f32.xlu0 %v428_v58 }
  0xe8   :  { %v1552_v12 = vpop.permute.xlu1 %913 }
  0xe9   :  { %453 = vadd.xlane.f32.xlu2 %v432_v1  ;;  %305 = vadd.xlane.f32.xlu1 %v283_v61 }
  0xec   :  { %307 = vadd.xlane.f32.xlu0 %v284_v2 }
  0xf0   :  { %v1558_v17 = vpop.permute.xlu1 %919 }
  0xf1   :  { %457 = vadd.xlane.f32.xlu2 %v434_v5  ;;  %455 = vadd.xlane.f32.xlu1 %v433_v6 }
 0x100   :  { %921 = vrot.lane.b32.xlu0 %v480_v7, %s1346_s3 }
 0x109   :  { %923 = vrot.lane.b32.xlu2 %v481_v8, %s1346_s3 }
 0x10a   :  { %925 = vrot.lane.b32.xlu1 %v482_v30, %s1346_s3 }
 0x126   :  { %v286_v20 = vpop.xlane.xlu0 %285 }
 0x127   :  { %v436_v21 = vpop.xlane.xlu1 %435  ;;  %v1565_v22 = vadd.f32 %v1560_v18, %v286_v20 }
 0x128   :  { %v1568_v26 = vadd.f32 %v1560_v18, %v436_v21 }
 0x129   :  { %v483_v27 = vsub.f32 0.0, %v1565_v22 }
 0x12a   :  { %v711_v28 = vand.u32 2147483647, %v1568_v26  ;;  %v699_v22 = vmax.f32 %v1568_v26, 0.0 }
 0x12b   :  { %v507_v29 = vand.u32 2147483647, %v483_v27 }
 0x12c   :  { %v723_v31 = vsub.f32 0.0, %v711_v28  ;;  %v298_v32 = vpop.xlane.xlu2 %297 }
 0x12d   :  { %v519_v33 = vsub.f32 0.0, %v507_v29  ;;  %v1575_v35 = vadd.f32 %v1560_v18, %v298_v32 }
 0x12e   :  { %v735_v36 = vmul.f32 1.442695, %v723_v31  ;;  %v288_v37 = vpop.xlane.xlu0 %287 }
 0x12f   :  { %v531_v38 = vmul.f32 1.442695, %v519_v33  ;;  %v489_v39 = vsub.f32 0.0, %v1575_v35  ;;  %v1579_v40 = vadd.f32 %v1560_v18, %v288_v37 }
 0x130   :  { %1161 = vpow2.f32 %v735_v36 }
 0x131   :  { %1163 = vpow2.f32 %v531_v38  ;;  %v513_v41 = vand.u32 2147483647, %v489_v39  ;;  %v484_v42 = vsub.f32 0.0, %v1579_v40 }
 0x133   :  { %v525_v43 = vsub.f32 0.0, %v513_v41  ;;  %v508_v44 = vand.u32 2147483647, %v484_v42 }
 0x134   :  { %v300_v45 = vpop.xlane.xlu1 %299  ;;  %v448_v49 = vpop.xlane.xlu2 %447 }
 0x135   :  { %v543_v46 = vmul.f32 1.442695, %v525_v43  ;;  %v520_v47 = vsub.f32 0.0, %v508_v44  ;;  %v1587_v48 = vadd.f32 %v1560_v18, %v300_v45  ;;  %v1590_v56 = vadd.f32 %v1560_v18, %v448_v49 }
 0x136   :  { %v1162_v50 = vpop.eup %1161  ;;  %v495_v43 = vmax.f32 %v483_v27, 0.0 }
 0x137   :  { %v1164_v51 = vpop.eup %1163  ;;  %v759_v52 = vadd.f32 1.0, %v1162_v50  ;;  %1165 = vpow2.f32 %v543_v46  ;;  %v533_v55 = vmul.f32 1.442695, %v520_v47  ;;  %v490_v57 = vsub.f32 0.0, %v1587_v48  ;;  %v440_v58 = vpop.xlane.xlu0 %439 }
 0x138   :  { %v555_v53 = vadd.f32 1.0, %v1164_v51  ;;  %v558_v54 = vmul.f32 -0.5, %v1164_v51  ;;  %v762_v59 = vmul.f32 -0.5, %v1162_v50  ;;  %v717_v62 = vand.u32 2147483647, %v1590_v56 }
 0x139   :  { %1167 = vlog2.f32 %v759_v52  ;;  %v514_v60 = vand.u32 2147483647, %v490_v57  ;;  %v1597_v63 = vadd.f32 %v1560_v18, %v440_v58  ;;  %v561_v4 = vand.u32 2147483647, %v1164_v51 }
 0x13a   :  { %1169 = vlog2.f32 %v555_v53  ;;  %v559_v61 = vadd.f32 1.0, %v558_v54  ;;  %v763_v3 = vadd.f32 1.0, %v762_v59  ;;  %v729_v6 = vsub.f32 0.0, %v717_v62 }
 0x13b   :  { %1171 = vpow2.f32 %v533_v55  ;;  %v526_v1 = vsub.f32 0.0, %v514_v60  ;;  %v765_v30 = vand.u32 2147483647, %v1162_v50  ;;  %v713_v20 = vand.u32 2147483647, %v1597_v63 }
 0x13c   :  { %v450_v2 = vpop.xlane.xlu1 %449  ;;  %v560_v29 = vmul.f32 %v1164_v51, %v559_v61  ;;  %v438_v32 = vpop.xlane.xlu2 %437  ;;  %v747_v37 = vmul.f32 1.442695, %v729_v6  ;;  %v764_v41 = vmul.f32 %v1162_v50, %v763_v3  ;;  %vm562_vm0 = vcmp.lt.f32.partialorder %v561_v4, 0.0004427343 }
 0x13d   :  { %v1599_v0 = vpop.eup %1165  ;;  %v545_v8 = vmul.f32 1.442695, %v526_v1  ;;  %v1604_v31 = vadd.f32 %v1560_v18, %v450_v2  ;;  %v725_v38 = vsub.f32 0.0, %v713_v20  ;;  %vm1608_vm1 = vcmp.lt.f32.partialorder %v765_v30, 0.0004427343 }
 0x13e   :  { %v609_v5 = vadd.f32 1.0, %v1599_v0  ;;  %v1613_v47 = vadd.f32 %v1560_v18, %v438_v32  ;;  %v612_v51 = vmul.f32 -0.5, %v1599_v0  ;;  %v615_v55 = vand.u32 2147483647, %v1599_v0 }
 0x13f   :  { %v1168_v7 = vpop.eup %1167  ;;  %v739_v50 = vmul.f32 1.442695, %v725_v38  ;;  %v718_v53 = vand.u32 2147483647, %v1604_v31  ;;  %v302_v58 = vpop.xlane.xlu0 %301  ;;  %v501_v4 = vmax.f32 %v489_v39, 0.0  ;;  %v496_v20 = vmax.f32 %v484_v42, 0.0 }
 0x140   :  { %v1170_v21 = vpop.eup %1169  ;;  %v761_v28 = vmul.f32 0.6931472, %v1168_v7  ;;  %1173 = vlog2.f32 %v609_v5  ;;  %v712_v61 = vand.u32 2147483647, %v1613_v47  ;;  %v613_v62 = vadd.f32 1.0, %v612_v51 }
 0x141   :  { %v1172_v33 = vpop.eup %1171  ;;  %v557_v36 = vmul.f32 0.6931472, %v1170_v21  ;;  %1175 = vpow2.f32 %v545_v8  ;;  %v730_v2 = vsub.f32 0.0, %v718_v53  ;;  %v1630_v6 = vadd.f32 %v1560_v18, %v302_v58 }
 0x142   :  { %v564_v44 = vadd.f32 1.0, %v1172_v33  ;;  %1177 = vpow2.f32 %v747_v37  ;;  %v767_v49 = vsel %vm1608_vm1, %v764_v41, %v761_v28  ;;  %v567_v52 = vmul.f32 -0.5, %v1172_v33 }
 0x143   :  { %v563_v46 = vsel %vm562_vm0, %v560_v29, %v557_v36  ;;  %v867_v60 = vadd.f32 %v767_v49, %v699_v22  ;;  %vm1632_vm3 = vcmp.lt.f32.partialorder %v615_v55, 0.0004427343  ;;  %v705_v21 = vmax.f32 %v1590_v56, 0.0 }
 0x144   :  { %1179 = vlog2.f32 %v564_v44  ;;  %v663_v27 = vadd.f32 %v563_v46, %v495_v43  ;;  %v568_v5 = vadd.f32 1.0, %v567_v52  ;;  %v570_v29 = vand.u32 2147483647, %v1172_v33  ;;  %v292_v42 = vpop.xlane.xlu2 %291 }
 0x145   :  { %1181 = vpow2.f32 %v739_v50  ;;  %v879_v28 = vmin.f32 %v867_v60, 100.0  ;;  %v724_v39 = vsub.f32 0.0, %v712_v61  ;;  %v614_v36 = vmul.f32 %v1599_v0, %v613_v62 }
 0x146   :  { %v1174_v54 = vpop.eup %1173  ;;  %v675_v26 = vmin.f32 %v663_v27, 100.0  ;;  %v749_v38 = vmul.f32 1.442695, %v730_v2  ;;  %v569_v43 = vmul.f32 %v1172_v33, %v568_v5  ;;  %v491_v40 = vsub.f32 0.0, %v1630_v6 }
 0x147   :  { %v1621_v59 = vpop.eup %1175  ;;  %v611_v30 = vmul.f32 0.6931472, %v1174_v54  ;;  %v939_v0 = vmul.f32 %v1542_v9, %v879_v28  ;;  %vm1651_vm4 = vcmp.lt.f32.partialorder %v570_v29, 0.0004427343  ;;  %v737_v33 = vmul.f32 1.442695, %v724_v39  ;;  %v290_v54 = vpop.xlane.xlu1 %289 }
 0x148   :  { %v618_v1 = vadd.f32 1.0, %v1621_v59  ;;  %v1625_v3 = vpop.eup %1177  ;;  %v687_v41 = vmul.f32 %v675_v26, %v1433_v14  ;;  %v621_v45 = vmul.f32 -0.5, %v1621_v59  ;;  %v1657_v14 = vmax.f32 %v490_v57, 0.0  ;;  %v452_v57 = vpop.xlane.xlu0 %451 }
 0x149   :  { %v813_v35 = vadd.f32 1.0, %v1625_v3  ;;  %v617_v44 = vsel %vm1632_vm3, %v614_v36, %v611_v30  ;;  %v816_v46 = vmul.f32 -0.5, %v1625_v3  ;;  %v624_v22 = vand.u32 2147483647, %v1621_v59 }
 0x14a   :  { %v1180_v7 = vpop.eup %1179  ;;  %1183 = vlog2.f32 %v618_v1  ;;  %v701_v27 = vmax.f32 %v1597_v63, 0.0  ;;  %v951_v52 = vadd.f32 %v939_v0, %v687_v41  ;;  %v669_v53 = vadd.f32 %v617_v44, %v501_v4 }
 0x14b   :  { %v1640_v32 = vpop.eup %1181  ;;  %v566_v37 = vmul.f32 0.6931472, %v1180_v7  ;;  %1185 = vlog2.f32 %v813_v35  ;;  %v515_v9 = vand.u32 2147483647, %v491_v40  ;;  %v622_v58 = vadd.f32 1.0, %v621_v45 }
 0x14c   :  { %v777_v49 = vadd.f32 1.0, %v1640_v32  ;;  %1187 = vpow2.f32 %v749_v38  ;;  %v817_v60 = vadd.f32 1.0, %v816_v46  ;;  %v819_v48 = vand.u32 2147483647, %v1625_v3  ;;  %v442_v45 = vpop.xlane.xlu2 %441 }
 0x14d   :  { %v572_v50 = vsel %vm1651_vm4, %v569_v43, %v566_v37  ;;  %1189 = vpow2.f32 %v737_v33  ;;  %v706_v1 = vmax.f32 %v1604_v31, 0.0  ;;  %v700_v2 = vmax.f32 %v1613_v47, 0.0 }
 0x14e   :  { %1191 = vlog2.f32 %v777_v49  ;;  %v664_v62 = vadd.f32 %v572_v50, %v496_v20  ;;  %v527_v26 = vsub.f32 0.0, %v515_v9  ;;  %vm1666_vm5 = vcmp.lt.f32.partialorder %v624_v22, 0.0004427343 }
 0x14f   :  { %v780_v6 = vmul.f32 -0.5, %v1640_v32  ;;  %v1672_v7 = vadd.f32 %v1560_v18, %v292_v42  ;;  %v1675_v30 = vsel %vm964_vm2, %v951_v52, 0.0  ;;  %v681_v8 = vmin.f32 %v669_v53, 100.0 }
 0x150   :  { %v1184_v55 = vpop.eup %1183  ;;  %v1678_v20 = vadd.f32 %v1560_v18, %v290_v54  ;;  %v1681_v28 = vadd.f32 %v1560_v18, %v452_v57  ;;  %v623_v39 = vmul.f32 %v1621_v59, %v622_v58  ;;  %v818_v36 = vmul.f32 %v1625_v3, %v817_v60  ;;  %v296_v5 = vpop.xlane.xlu0 %295 }
 0x151   :  { %v1186_v61 = vpop.eup %1185  ;;  %v620_v35 = vmul.f32 0.6931472, %v1184_v55  ;;  %vm1687_vm6 = vcmp.lt.f32.partialorder %v819_v48, 0.0004427343  ;;  %v676_v41 = vmin.f32 %v664_v62, 100.0  ;;  %v781_v59 = vadd.f32 1.0, %v780_v6  ;;  %v294_v55 = vpop.xlane.xlu1 %293 }
 0x152   :  { %v815_v4 = vmul.f32 0.6931472, %v1186_v61  ;;  %v1683_v29 = vpop.eup %1187  ;;  %v783_v43 = vand.u32 2147483647, %v1640_v32  ;;  %v547_v44 = vmul.f32 1.442695, %v527_v26  ;;  %v693_v51 = vmul.f32 %v681_v8, %v1461_v24 }
 0x153   :  { %v1691_v38 = vpop.eup %1189  ;;  %v822_v42 = vadd.f32 1.0, %v1683_v29  ;;  %v486_v0 = vsub.f32 0.0, %v1672_v7  ;;  %v485_v33 = vsub.f32 0.0, %v1678_v20  ;;  %v719_v50 = vand.u32 2147483647, %v1681_v28 }
 0x154   :  { %v1192_v46 = vpop.eup %1191  ;;  %v821_v49 = vsel %vm1687_vm6, %v818_v36, %v815_v4  ;;  %v768_v3 = vadd.f32 1.0, %v1691_v38  ;;  %v626_v22 = vsel %vm1666_vm5, %v623_v39, %v620_v35  ;;  %v1704_v52 = vmax.f32 %v491_v40, 0.0 }
 0x155   :  { %1193 = vlog2.f32 %v822_v42  ;;  %v1707_v53 = vadd.f32 %v1560_v18, %v442_v45  ;;  %v873_v9 = vadd.f32 %v821_v49, %v705_v21  ;;  %v779_v54 = vmul.f32 0.6931472, %v1192_v46 }
 0x156   :  { %1195 = vlog2.f32 %v768_v3  ;;  %vm1711_vm7 = vcmp.lt.f32.partialorder %v783_v43, 0.0004427343  ;;  %v1716_v58 = vmul.f32 %v676_v41, %v1426_v13  ;;  %v782_v60 = vmul.f32 %v1640_v32, %v781_v59 }
 0x157   :  { %1197 = vpow2.f32 %v547_v44  ;;  %v825_v40 = vmul.f32 -0.5, %v1683_v29  ;;  %v510_v48 = vand.u32 2147483647, %v486_v0  ;;  %v670_v56 = vadd.f32 %v626_v22, %v1657_v14 }
 0x158   :  { %v509_v21 = vand.u32 2147483647, %v485_v33  ;;  %v707_v57 = vmax.f32 %v1681_v28, 0.0  ;;  %v731_v61 = vsub.f32 0.0, %v719_v50  ;;  %v771_v62 = vmul.f32 -0.5, %v1691_v38 }
 0x159   :  { %v522_v26 = vsub.f32 0.0, %v510_v48  ;;  %v714_v13 = vand.u32 2147483647, %v1707_v53  ;;  %v1729_v32 = vadd.f32 %v1560_v18, %v294_v55  ;;  %v885_v6 = vmin.f32 %v873_v9, 100.0 }
 0x15a   :  { %v785_v14 = vsel %vm1711_vm7, %v782_v60, %v779_v54  ;;  %v521_v8 = vsub.f32 0.0, %v509_v21  ;;  %v751_v35 = vmul.f32 1.442695, %v731_v61  ;;  %v826_v36 = vadd.f32 1.0, %v825_v40 }
 0x15b   :  { %v1194_v4 = vpop.eup %1193  ;;  %v828_v37 = vand.u32 2147483647, %v1683_v29  ;;  %v537_v41 = vmul.f32 1.442695, %v522_v26  ;;  %v726_v43 = vsub.f32 0.0, %v714_v13  ;;  %v487_v45 = vsub.f32 0.0, %v1729_v32  ;;  %v304_v13 = vpop.xlane.xlu2 %303 }
 0x15c   :  { %v1196_v39 = vpop.eup %1195  ;;  %v535_v44 = vmul.f32 1.442695, %v521_v8  ;;  %1199 = vpow2.f32 %v751_v35  ;;  %v1738_v46 = vadd.f32 %v1560_v18, %v296_v5  ;;  %v869_v49 = vadd.f32 %v785_v14, %v701_v27 }
 0x15d   :  { %v1734_v42 = vpop.eup %1197  ;;  %v824_v59 = vmul.f32 0.6931472, %v1194_v4  ;;  %v772_v3 = vadd.f32 1.0, %v771_v62  ;;  %v774_v50 = vand.u32 2147483647, %v1691_v38  ;;  %v945_v22 = vmul.f32 %v1556_v16, %v885_v6 }
 0x15e   :  { %v627_v9 = vadd.f32 1.0, %v1734_v42  ;;  %1201 = vpow2.f32 %v537_v41  ;;  %v741_v54 = vmul.f32 1.442695, %v726_v43  ;;  %v682_v24 = vmin.f32 %v670_v56, 100.0 }
 0x15f   :  { %v827_v55 = vmul.f32 %v1683_v29, %v826_v36  ;;  %v770_v60 = vmul.f32 0.6931472, %v1196_v39  ;;  %v702_v40 = vmax.f32 %v1707_v53, 0.0  ;;  %vm1747_vm8 = vcmp.lt.f32.partialorder %v828_v37, 0.0004427343 }
 0x160   :  { %1203 = vpow2.f32 %v535_v44  ;;  %v511_v63 = vand.u32 2147483647, %v487_v45  ;;  %v488_v27 = vsub.f32 0.0, %v1738_v46  ;;  %v881_v21 = vmin.f32 %v869_v49, 100.0 }
 0x161   :  { %v830_v16 = vsel %vm1747_vm8, %v827_v55, %v824_v59  ;;  %v773_v61 = vmul.f32 %v1691_v38, %v772_v3  ;;  %1205 = vpow2.f32 %v741_v54  ;;  %v957_v29 = vadd.f32 %v945_v22, %v693_v51 }
 0x162   :  { %v1200_v56 = vpop.eup %1199  ;;  %vm1755_vm9 = vcmp.lt.f32.partialorder %v774_v50, 0.0004427343  ;;  %1207 = vlog2.f32 %v627_v9  ;;  %v630_v26 = vmul.f32 -0.5, %v1734_v42  ;;  %v633_v5 = vand.u32 2147483647, %v1734_v42 }
 0x163   :  { %v776_v32 = vsel %vm1755_vm9, %v773_v61, %v770_v60  ;;  %v831_v4 = vadd.f32 1.0, %v1200_v56  ;;  %v523_v6 = vsub.f32 0.0, %v511_v63  ;;  %v1764_v38 = vmul.f32 %v682_v24, %v1466_v25 }
 0x164   :  { %v1202_v14 = vpop.eup %1201  ;;  %v874_v51 = vadd.f32 %v830_v16, %v706_v1  ;;  %v1770_v8 = vmax.f32 %v486_v0, 0.0  ;;  %v512_v35 = vand.u32 2147483647, %v488_v27  ;;  %v1776_v36 = vmax.f32 %v485_v33, 0.0 }
 0x165   :  { %v582_v39 = vadd.f32 1.0, %v1202_v14  ;;  %v834_v37 = vmul.f32 -0.5, %v1200_v56  ;;  %v1779_v41 = vadd.f32 %v1560_v18, %v304_v13  ;;  %v1782_v31 = vsel %vm964_vm2, %v957_v29, 0.0 }
 0x166   :  { %v1204_v25 = vpop.eup %1203  ;;  %v1785_v1 = vmul.f32 %v1548_v10, %v881_v21  ;;  %v868_v7 = vadd.f32 %v776_v32, %v700_v2  ;;  %1209 = vlog2.f32 %v831_v4  ;;  %v631_v20 = vadd.f32 1.0, %v630_v26 }
 0x167   :  { %v1789_v0 = vpop.eup %1205  ;;  %vm1791_vm10 = vcmp.lt.f32.partialorder %v633_v5, 0.0004427343  ;;  %1211 = vlog2.f32 %v582_v39  ;;  %v539_v43 = vmul.f32 1.442695, %v523_v6  ;;  %v886_v49 = vmin.f32 %v874_v51, 100.0 }
 0x168   :  { %v1208_v44 = vpop.eup %1207  ;;  %v585_v59 = vmul.f32 -0.5, %v1202_v14  ;;  %v573_v3 = vadd.f32 1.0, %v1204_v25  ;;  %v524_v50 = vsub.f32 0.0, %v512_v35  ;;  %v576_v10 = vmul.f32 -0.5, %v1204_v25 }
 0x169   :  { %v835_v22 = vadd.f32 1.0, %v834_v37  ;;  %v1795_v9 = vmax.f32 %v487_v45, 0.0  ;;  %v492_v47 = vsub.f32 0.0, %v1779_v41  ;;  %v880_v2 = vmin.f32 %v868_v7, 100.0  ;;  %v444_v45 = vpop.xlane.xlu1 %443 }
 0x16a   :  { %1213 = vlog2.f32 %v573_v3  ;;  %v837_v54 = vand.u32 2147483647, %v1200_v56  ;;  %v786_v24 = vadd.f32 1.0, %v1789_v0  ;;  %v629_v55 = vmul.f32 0.6931472, %v1208_v44 }
 0x16b   :  { %v632_v60 = vmul.f32 %v1734_v42, %v631_v20  ;;  %v588_v48 = vand.u32 2147483647, %v1202_v14  ;;  %1215 = vpow2.f32 %v539_v43  ;;  %v586_v21 = vadd.f32 1.0, %v585_v59 }
 0x16c   :  { %v1210_v63 = vpop.eup %1209  ;;  %1217 = vlog2.f32 %v786_v24  ;;  %v789_v16 = vmul.f32 -0.5, %v1789_v0  ;;  %v541_v61 = vmul.f32 1.442695, %v524_v50  ;;  %v577_v62 = vadd.f32 1.0, %v576_v10  ;;  %v446_v10 = vpop.xlane.xlu0 %445 }
 0x16d   :  { %v1212_v29 = vpop.eup %1211  ;;  %v833_v26 = vmul.f32 0.6931472, %v1210_v63  ;;  %v836_v13 = vmul.f32 %v1200_v56, %v835_v22  ;;  %v516_v32 = vand.u32 2147483647, %v492_v47  ;;  %v579_v4 = vand.u32 2147483647, %v1204_v25 }
 0x16e   :  { %v584_v5 = vmul.f32 0.6931472, %v1212_v29  ;;  %vm1803_vm11 = vcmp.lt.f32.partialorder %v837_v54, 0.0004427343  ;;  %1219 = vpow2.f32 %v541_v61  ;;  %v946_v6 = vmul.f32 %v1562_v19, %v886_v49 }
 0x16f   :  { %v940_v51 = vmul.f32 %v1546_v34, %v880_v2  ;;  %v839_v35 = vsel %vm1803_vm11, %v836_v13, %v833_v26  ;;  %v1812_v39 = vadd.f32 %v1560_v18, %v444_v45  ;;  %v635_v37 = vsel %vm1791_vm10, %v632_v60, %v629_v55 }
 0x170   :  { %v1214_v56 = vpop.eup %1213  ;;  %v587_v7 = vmul.f32 %v1202_v14, %v586_v21  ;;  %v790_v20 = vadd.f32 1.0, %v789_v16  ;;  %v528_v43 = vsub.f32 0.0, %v516_v32  ;;  %vm1818_vm12 = vcmp.lt.f32.partialorder %v588_v48, 0.0004427343  ;;  %v454_v16 = vpop.xlane.xlu2 %453 }
 0x171   :  { %v1816_v44 = vpop.eup %1215  ;;  %v575_v34 = vmul.f32 0.6931472, %v1214_v56  ;;  %v578_v19 = vmul.f32 %v1204_v25, %v577_v62  ;;  %v792_v49 = vand.u32 2147483647, %v1789_v0  ;;  %vm580_vm13 = vcmp.lt.f32.partialorder %v579_v4, 0.0004427343 }
 0x172   :  { %v1218_v3 = vpop.eup %1217  ;;  %v590_v50 = vsel %vm1818_vm12, %v587_v7, %v584_v5  ;;  %v875_v14 = vadd.f32 %v839_v35, %v707_v57  ;;  %v591_v33 = vadd.f32 1.0, %v1816_v44  ;;  %v671_v22 = vadd.f32 %v635_v37, %v1704_v52  ;;  %v306_v5 = vpop.xlane.xlu1 %305 }
 0x173   :  { %v581_v2 = vsel %vm580_vm13, %v578_v19, %v575_v34  ;;  %v788_v54 = vmul.f32 0.6931472, %v1218_v3  ;;  %v715_v24 = vand.u32 2147483647, %v1812_v39  ;;  %v952_v55 = vadd.f32 %v940_v51, %v1716_v58  ;;  %v1258_v34 = vld [vmem:[%s2000_s2 + $0x18] sm:$0xff] }
 0x174   :  { %v1830_v25 = vpop.eup %1219  ;;  %v791_v60 = vmul.f32 %v1789_v0, %v790_v20  ;;  %v1836_v48 = vmax.f32 %v488_v27, 0.0  ;;  %v549_v28 = vmul.f32 1.442695, %v528_v43  ;;  %v666_v57 = vadd.f32 %v590_v50, %v1770_v8  ;;  %v308_v43 = vpop.xlane.xlu0 %307 }
 0x175   :  { %v665_v63 = vadd.f32 %v581_v2, %v1776_v36  ;;  %vm1840_vm14 = vcmp.lt.f32.partialorder %v792_v49, 0.0004427343  ;;  %v1845_v21 = vadd.f32 %v1560_v18, %v446_v10  ;;  %v887_v58 = vmin.f32 %v875_v14, 100.0 }
 0x176   :  { %v794_v0 = vsel %vm1840_vm14, %v791_v60, %v788_v54  ;;  %1221 = vlog2.f32 %v591_v33  ;;  %v600_v46 = vadd.f32 1.0, %v1830_v25  ;;  %v1851_v27 = vadd.f32 %v946_v6, %v1764_v38 }
 0x177   :  { %v683_v8 = vmin.f32 %v671_v22, 100.0  ;;  %v594_v36 = vmul.f32 -0.5, %v1816_v44  ;;  %v727_v61 = vsub.f32 0.0, %v715_v24  ;;  %v966_v45 = vsel %vm964_vm2, %v952_v55, 0.0 }
 0x178   :  { %v1857_v29 = vmax.f32 %v492_v47, 0.0  ;;  %1223 = vpow2.f32 %v549_v28  ;;  %v1860_v62 = vadd.f32 %v1560_v18, %v454_v16  ;;  %v677_v26 = vmin.f32 %v665_v63, 100.0  ;;  %v458_v28 = vpop.xlane.xlu2 %457 }
 0x179   :  { %v870_v13 = vadd.f32 %v794_v0, %v702_v40  ;;  %v743_v38 = vmul.f32 1.442695, %v727_v61  ;;  %v716_v32 = vand.u32 2147483647, %v1845_v21  ;;  %v678_v4 = vmin.f32 %v666_v57, 100.0 }
 0x17a   :  { %v947_v42 = vmul.f32 %v1558_v17, %v887_v58  ;;  %v597_v6 = vand.u32 2147483647, %v1816_v44  ;;  %1225 = vlog2.f32 %v600_v46  ;;  %v967_v41 = vadd.f32 %v966_v45, %v1675_v30  ;;  %v1257_v17 = vld [vmem:[%s2000_s2 + $0x10] sm:$0xff] }
 0x17b   :  { %v695_v47 = vmul.f32 %v683_v8, %v1456_v23  ;;  %v595_v51 = vadd.f32 1.0, %v594_v36  ;;  %1227 = vpow2.f32 %v743_v38  ;;  %v603_v53 = vmul.f32 -0.5, %v1830_v25 }
 0x17c   :  { %v1222_v35 = vpop.eup %1221  ;;  %v606_v40 = vand.u32 2147483647, %v1830_v25  ;;  %v703_v56 = vmax.f32 %v1812_v39, 0.0  ;;  %v1873_v37 = vadd.f32 %v1560_v18, %v306_v5  ;;  %v689_v7 = vmul.f32 %v1257_v17, %v677_v26  ;;  %v1259_v39 = vld [vmem:[%s2000_s2 + $0x20] sm:$0xff] }
 0x17d   :  { %v882_v30 = vmin.f32 %v870_v13, 100.0  ;;  %v704_v23 = vmax.f32 %v1845_v21, 0.0  ;;  %v728_v20 = vsub.f32 0.0, %v716_v32  ;;  %v690_v19 = vmul.f32 %v1258_v34, %v678_v4  ;;  %v456_v13 = vpop.xlane.xlu1 %455 }
 0x17e   :  { %v1879_v59 = vpop.eup %1223  ;;  %v1884_v49 = vadd.f32 %v947_v42, %v695_v47  ;;  %vm1886_vm15 = vcmp.lt.f32.partialorder %v597_v6, 0.0004427343  ;;  %v708_v50 = vmax.f32 %v1860_v62, 0.0  ;;  %v593_v14 = vmul.f32 0.6931472, %v1222_v35 }
 0x17f   :  { %v596_v33 = vmul.f32 %v1816_v44, %v595_v51  ;;  %v745_v10 = vmul.f32 1.442695, %v728_v20  ;;  %v720_v22 = vand.u32 2147483647, %v1860_v62  ;;  %v604_v54 = vadd.f32 1.0, %v603_v53 }
 0x180   :  { %v1226_v2 = vpop.eup %1225  ;;  %vm1893_vm0 = vcmp.lt.f32.partialorder %v606_v40, 0.0004427343  ;;  %v493_v55 = vsub.f32 0.0, %v1873_v37  ;;  %v1899_v60 = vadd.f32 %v1560_v18, %v308_v43  ;;  %v953_v63 = vadd.f32 %v1785_v1, %v689_v7 }
 0x181   :  { %v1228_v57 = vpop.eup %1227  ;;  %v942_v44 = vmul.f32 %v1550_v11, %v882_v30  ;;  %1229 = vpow2.f32 %v745_v10  ;;  %v732_v52 = vsub.f32 0.0, %v720_v22  ;;  %v636_v16 = vadd.f32 1.0, %v1879_v59 }
 0x182   :  { %v639_v58 = vmul.f32 -0.5, %v1879_v59  ;;  %v795_v0 = vadd.f32 1.0, %v1228_v57  ;;  %v798_v46 = vmul.f32 -0.5, %v1228_v57  ;;  %v599_v8 = vsel %vm1886_vm15, %v596_v33, %v593_v14 }
 0x183   :  { %v753_v36 = vmul.f32 1.442695, %v732_v52  ;;  %v494_v61 = vsub.f32 0.0, %v1899_v60  ;;  %v1909_v45 = vadd.f32 %v1560_v18, %v458_v28  ;;  %v602_v1 = vmul.f32 0.6931472, %v1226_v2 }
 0x184   :  { %v605_v11 = vmul.f32 %v1830_v25, %v604_v54  ;;  %1231 = vlog2.f32 %v795_v0  ;;  %v517_v26 = vand.u32 2147483647, %v493_v55  ;;  %v968_v38 = vsel %vm964_vm2, %v953_v63, 0.0 }
 0x185   :  { %v954_v32 = vadd.f32 %v942_v44, %v690_v19  ;;  %v642_v5 = vand.u32 2147483647, %v1879_v59  ;;  %1233 = vpow2.f32 %v753_v36  ;;  %v667_v4 = vadd.f32 %v599_v8, %v1795_v9 }
 0x186   :  { %v799_v42 = vadd.f32 1.0, %v798_v46  ;;  %v529_v6 = vsub.f32 0.0, %v517_v26  ;;  %v518_v47 = vand.u32 2147483647, %v494_v61  ;;  %1235 = vlog2.f32 %v636_v16 }
 0x187   :  { %v1230_v51 = vpop.eup %1229  ;;  %v640_v25 = vadd.f32 1.0, %v639_v58  ;;  %v722_v35 = vand.u32 2147483647, %v1909_v45  ;;  %v1921_v53 = vadd.f32 %v1560_v18, %v456_v13  ;;  %v969_v40 = vadd.f32 %v968_v38, %v967_v41 }
 0x188   :  { %v608_v17 = vsel %vm1893_vm0, %v605_v11, %v602_v1  ;;  %v801_v7 = vand.u32 2147483647, %v1228_v57  ;;  %v804_v30 = vadd.f32 1.0, %v1230_v51  ;;  %v807_v9 = vmul.f32 -0.5, %v1230_v51 }
 0x189   :  { %v551_v20 = vmul.f32 1.442695, %v529_v6  ;;  %v530_v43 = vsub.f32 0.0, %v518_v47  ;;  %v734_v34 = vsub.f32 0.0, %v722_v35  ;;  %v679_v3 = vmin.f32 %v667_v4, 100.0 }
 0x18a   :  { %v1232_v19 = vpop.eup %1231  ;;  %v800_v14 = vmul.f32 %v1228_v57, %v799_v42  ;;  %1237 = vlog2.f32 %v804_v30  ;;  %v721_v33 = vand.u32 2147483647, %v1921_v53  ;;  %v668_v2 = vadd.f32 %v608_v17, %v1836_v48 }
 0x18b   :  { %v1926_v10 = vpop.eup %1233  ;;  %v797_v18 = vmul.f32 0.6931472, %v1232_v19  ;;  %1239 = vpow2.f32 %v551_v20  ;;  %v553_v41 = vmul.f32 1.442695, %v530_v43  ;;  %v757_v22 = vmul.f32 1.442695, %v734_v34 }
 0x18c   :  { %vm1929_vm1 = vcmp.lt.f32.partialorder %v642_v5, 0.0004427343  ;;  %vm802_vm3 = vcmp.lt.f32.partialorder %v801_v7, 0.0004427343  ;;  %v733_v24 = vsub.f32 0.0, %v721_v33  ;;  %v840_v28 = vadd.f32 1.0, %v1926_v10  ;;  %v1236_v57 = vpop.eup %1235 }
 0x18d   :  { %v803_v63 = vsel %vm802_vm3, %v800_v14, %v797_v18  ;;  %v808_v44 = vadd.f32 1.0, %v807_v9  ;;  %v810_v52 = vand.u32 2147483647, %v1230_v51  ;;  %1241 = vpow2.f32 %v553_v41  ;;  %v1260_v9 = vld [vmem:[%s2000_s2 + $0x28] sm:$0xff] }
 0x18e   :  { %v871_v16 = vadd.f32 %v803_v63, %v703_v56  ;;  %1243 = vpow2.f32 %v757_v22  ;;  %v755_v58 = vmul.f32 1.442695, %v733_v24  ;;  %v843_v48 = vmul.f32 -0.5, %v1926_v10 }
 0x18f   :  { %v970_v0 = vsel %vm964_vm2, %v954_v32, 0.0  ;;  %v641_v46 = vmul.f32 %v1879_v59, %v640_v25  ;;  %1245 = vlog2.f32 %v840_v28  ;;  %vm99_vm4 = vcmask 0  }
 0x190   :  { %v1238_v8 = vpop.eup %1237  ;;  %v680_v36 = vmin.f32 %v668_v2, 100.0  ;;  %v883_v1 = vmin.f32 %v871_v16, 100.0  ;;  %1247 = vpow2.f32 %v755_v58  ;;  %v691_v56 = vmul.f32 %v1259_v39, %v679_v3 }
 0x191   :  { %v1240_v11 = vpop.eup %1239  ;;  %v638_v26 = vmul.f32 0.6931472, %v1236_v57  ;;  %v806_v13 = vmul.f32 0.6931472, %v1238_v8  ;;  %v809_v38 = vmul.f32 %v1230_v51, %v808_v44  ;;  %v1347_v5 = vmov 0.0  }
 0x192   :  { %100 = vst.msk [vmem:[#allocation2] sm:$0x1] %vm99_vm4, %v1347_v5  ;;  %v943_v59 = vmul.f32 %v1554_v15, %v883_v1  ;;  %vm811_vm5 = vcmp.lt.f32.partialorder %v810_v52, 0.0004427343  ;;  %v645_v32 = vadd.f32 1.0, %v1240_v11  ;;  %v844_v4 = vadd.f32 1.0, %v843_v48 }
 0x193   :  { %v1242_v42 = vpop.eup %1241  ;;  %v971_v6 = vadd.f32 %v970_v0, %v969_v40  ;;  %v812_v47 = vsel %vm811_vm5, %v809_v38, %v806_v13  ;;  %v648_v25 = vmul.f32 -0.5, %v1240_v11  ;;  %v846_v35 = vand.u32 2147483647, %v1926_v10 }
 0x194   :  { %v1945_v17 = vpop.eup %1243  ;;  %v955_v7 = vadd.f32 %v943_v59, %v691_v56  ;;  %v872_v51 = vadd.f32 %v812_v47, %v704_v23  ;;  %v505_v30 = vmax.f32 %v493_v55, 0.0  ;;  %1249 = vlog2.f32 %v645_v32  ;;  %v922_v56 = vpop.permute.xlu0 %921 }
 0x195   :  { %v1246_v15 = vpop.eup %1245  ;;  %v692_v40 = vmul.f32 %v1260_v9, %v680_v36  ;;  %v644_v20 = vsel %vm1929_vm1, %v641_v46, %v638_v26  ;;  %v654_v43 = vadd.f32 1.0, %v1242_v42  ;;  %v657_v34 = vmul.f32 -0.5, %v1242_v42 }
 0x196   :  { %v1248_v19 = vpop.eup %1247  ;;  %v972_v3 = vsel %vm964_vm2, %v955_v7, 0.0  ;;  %v884_v21 = vmin.f32 %v872_v51, 100.0  ;;  %v842_v23 = vmul.f32 0.6931472, %v1246_v15  ;;  %v845_v37 = vmul.f32 %v1926_v10, %v844_v4 }
 0x197   :  { %v649_v55 = vadd.f32 1.0, %v648_v25  ;;  %v506_v14 = vmax.f32 %v494_v61, 0.0  ;;  %1251 = vlog2.f32 %v654_v43  ;;  %vm847_vm6 = vcmp.lt.f32.partialorder %v846_v35, 0.0004427343 }
 0x198   :  { %v944_v33 = vmul.f32 %v1552_v12, %v884_v21  ;;  %v651_v18 = vand.u32 2147483647, %v1240_v11  ;;  %v848_v41 = vsel %vm847_vm6, %v845_v37, %v842_v23  ;;  %v849_v22 = vadd.f32 1.0, %v1248_v19  ;;  %v926_v23 = vpop.permute.xlu1 %925 }
 0x199   :  { %v973_v2 = vadd.f32 %v972_v3, %v971_v6  ;;  %v658_v54 = vadd.f32 1.0, %v657_v34  ;;  %v852_v24 = vmul.f32 -0.5, %v1248_v19  ;;  %v858_v28 = vadd.f32 1.0, %v1945_v17  ;;  %v924_v34 = vpop.permute.xlu2 %923 }
 0x19a   :  { %v1250_v57 = vpop.eup %1249  ;;  %v956_v63 = vadd.f32 %v944_v33, %v692_v40  ;;  %v876_v10 = vadd.f32 %v848_v41, %v708_v50  ;;  %1253 = vlog2.f32 %v849_v22  ;;  %v861_v60 = vmul.f32 -0.5, %v1945_v17 }
 0x19b   :  { %v647_v61 = vmul.f32 0.6931472, %v1250_v57  ;;  %v650_v44 = vmul.f32 %v1240_v11, %v649_v55  ;;  %v660_v52 = vand.u32 2147483647, %v1242_v42  ;;  %1255 = vlog2.f32 %v858_v28  ;;  %v1262_v55 = vld [vmem:[%s2000_s2 + $0x50] sm:$0xff] }
 0x19c   :  { %v672_v12 = vadd.f32 %v644_v20, %v1857_v29  ;;  %v974_v16 = vsel %vm964_vm2, %v956_v63, 0.0  ;;  %vm1967_vm7 = vcmp.lt.f32.partialorder %v651_v18, 0.0004427343  ;;  %v978_v48 = vsel %vm964_vm2, %v1851_v27, 0.0  ;;  %v1263_v18 = vld [vmem:[%s2000_s2 + $0x58] sm:$0xff] }
 0x19d   :  { %v1252_v62 = vpop.eup %1251  ;;  %v975_v50 = vadd.f32 %v974_v16, %v973_v2  ;;  %v653_v0 = vsel %vm1967_vm7, %v650_v44, %v647_v61  ;;  %v659_v46 = vmul.f32 %v1242_v42, %v658_v54  ;;  %v853_v8 = vadd.f32 1.0, %v852_v24  ;;  %v963_v16 = vld [vmem:[#allocation2] sm:$0x1] }
 0x19e   :  { %v656_v36 = vmul.f32 0.6931472, %v1252_v62  ;;  %v888_v1 = vmin.f32 %v876_v10, 100.0  ;;  %v855_v11 = vand.u32 2147483647, %v1248_v19  ;;  %v862_v29 = vadd.f32 1.0, %v861_v60 }
 0x19f   :  { %vm661_vm8 = vcmp.lt.f32.partialorder %v660_v52, 0.0004427343  ;;  %v977_v39 = vadd.f32 %v1782_v31, %v975_v50  ;;  %v864_v26 = vand.u32 2147483647, %v1945_v17  ;;  %v684_v38 = vmin.f32 %v672_v12, 100.0 }
 0x1a0   :  { %v1254_v13 = vpop.eup %1253  ;;  %v673_v27 = vadd.f32 %v653_v0, %v505_v30  ;;  %v662_v5 = vsel %vm661_vm8, %v659_v46, %v656_v36  ;;  %v709_v59 = vmax.f32 %v1921_v53, 0.0  ;;  %v1348_v32 = vmov 0   ;;  %v1261_v53 = vld [vmem:[%s2000_s2 + $0x48] sm:$0xff]  ;;  %s1349_s2 = smov [#allocation9]  }
 0x1a1   :  { %1157 = vset.pattern.permute.xlu0 %v1348_v32  ;;  %v1256_v4 = vpop.eup %1255  ;;  %v674_v42 = vadd.f32 %v662_v5, %v506_v14  ;;  %v979_v6 = vadd.f32 %v978_v48, %v977_v39  ;;  %v851_v47 = vmul.f32 0.6931472, %v1254_v13  ;;  %v854_v25 = vmul.f32 %v1248_v19, %v853_v8  ;;  %s1014_s1 = sshll.u32 %s1349_s2, 4  ;;  %s1015_s1 = int_to_ptr.vmem [resolvable:$true] %s1014_s1 }
 0x1a2   :  { %v948_v35 = vmul.f32 %v922_v56, %v888_v1  ;;  %vm856_vm9 = vcmp.lt.f32.partialorder %v855_v11, 0.0004427343  ;;  %v860_v7 = vmul.f32 0.6931472, %v1256_v4  ;;  %v863_v31 = vmul.f32 %v1945_v17, %v862_v29 }
 0x1a3   :  { %v710_v51 = vmax.f32 %v1909_v45, 0.0  ;;  %v857_v15 = vsel %vm856_vm9, %v854_v25, %v851_v47  ;;  %vm865_vm10 = vcmp.lt.f32.partialorder %v864_v26, 0.0004427343  ;;  %v685_v30 = vmin.f32 %v673_v27, 100.0 }
 0x1a4   :  { %v696_v9 = vmul.f32 %v1261_v53, %v684_v38  ;;  %v877_v40 = vadd.f32 %v857_v15, %v709_v59  ;;  %v866_v20 = vsel %vm865_vm10, %v863_v31, %v860_v7  ;;  %v686_v43 = vmin.f32 %v674_v42, 100.0 }
 0x1a5   :  { %v878_v19 = vadd.f32 %v866_v20, %v710_v51  ;;  %v980_v3 = vsel %vm964_vm2, %v1884_v49, 0.0  ;;  %v697_v14 = vmul.f32 %v1262_v55, %v685_v30 }
 0x1a6   :  { %v960_v21 = vadd.f32 %v948_v35, %v696_v9  ;;  %v889_v17 = vmin.f32 %v877_v40, 100.0  ;;  %v981_v45 = vadd.f32 %v980_v3, %v979_v6  ;;  %v698_v41 = vmul.f32 %v1263_v18, %v686_v43 }
 0x1a7   :  { %v890_v37 = vmin.f32 %v878_v19, 100.0 }
 0x1a8   :  { %v949_v33 = vmul.f32 %v924_v34, %v889_v17  ;;  %v982_v2 = vsel %vm964_vm2, %v960_v21, 0.0 }
 0x1a9   :  { %v950_v22 = vmul.f32 %v926_v23, %v890_v37  ;;  %v983_v54 = vadd.f32 %v982_v2, %v981_v45 }
 0x1aa   :  { %v961_v49 = vadd.f32 %v949_v33, %v697_v14 }
 0x1ab   :  { %v962_v24 = vadd.f32 %v950_v22, %v698_v41 }
 0x1ac   :  { %v984_v28 = vsel %vm964_vm2, %v961_v49, 0.0 }
 0x1ad   :  { %v985_v57 = vadd.f32 %v984_v28, %v983_v54  ;;  %v986_v63 = vsel %vm964_vm2, %v962_v24, 0.0 }
 0x1af   :  { %v987_v10 = vadd.f32 %v986_v63, %v985_v57 }
 0x1b1   :  { %v988_v60 = vrot.slane %v987_v10, 4 }
 0x1b3   :  { %v989_v61 = vadd.f32 %v988_v60, %v987_v10 }
 0x1b5   :  { %v990_v44 = vrot.slane %v989_v61, 2 }
 0x1b7   :  { %v991_v52 = vadd.f32 %v990_v44, %v989_v61 }
 0x1b9   :  { %v992_v12 = vrot.slane %v991_v52, 1 }
 0x1bb   :  { %v993_v58 = vadd.f32 %v992_v12, %v991_v52 }
 0x1bd   :  { %v994_v48 = vadd.f32 %v993_v58, %v963_v16 }
 0x1bf   :  { %996 = vst.msk [vmem:[#allocation2] sm:$0x1] %vm99_vm4, %v994_v48 }
 0x1c6   :  { %v1000_v62 = vld [vmem:[#allocation2] sm:$0x1] }
 0x1c7   :  { %v1001_v50 = vmul.f32 0.0052083335, %v1000_v62 }
 0x1c9   :  { %v1003_v0 = vperm.slane %v1001_v50, 0 }
 0x1cb   :  { %1005 = vperm.xlu0 %1157, %v1003_v0  }
 0x23d   :  { %v1006_v46 = vpop.permute.xlu0 %1005 }
 0x23e   :  { %1008 = vst [vmem:[#allocation9] sm:$0xff] %v1006_v46 }
 0x23f   :  { %1019 = dma.vmem_to_hbm [thread:$0]  %s1015_s1, 128, %s1017_s18, [#allocation6]  }
 0x240   :  { %1340 = dma.done.wait [#allocation6], 128  }
 0x241   :  { %1341 = vsyncadd [#allocation6], 4294967168 }
 0x242   :  { %1024 = vsyncpa [#allocation5], 1 }
 0x243   :  { %1025 = vsyncpa [#allocation8], 1 }
 0x244   :  { %1026 = vsyncpa [#allocation6], 1 }

// kernel: tpu_custom_call.1
= control target key start
LH: loop header
LB: loop body
LE: loop exit
PB: predicated region body
PF: predicated region fallthrough
CT: control target
= control target key end

     0   :  { %s1998_s0 = inlined_call_operand.hbm [shape: bf16[96,128], index: 0, kind: input, shape index: {}]   ;;  %s1999_s1 = inlined_call_operand.hbm [shape: bf16[96,128], index: 1, kind: input, shape index: {}]   ;;  %s2000_s2 = inlined_call_operand.vmem [shape: f32[96,2], index: 2, kind: input, shape index: {}]   ;;  %s2001_s3 = inlined_call_operand.vmem [shape: bf16[128,128], index: 3, kind: input, shape index: {}]   ;;  %s2002_s4 = inlined_call_operand.vmem [shape: f32[1,128], index: 4, kind: input, shape index: {}]   ;;  %s2003_s5 = inlined_call_operand.vmem [shape: f32[1,128], index: 5, kind: input, shape index: {}]   ;;  %s2004_s6 = inlined_call_operand.<no memory space> [shape: f32[1,1], index: 6, kind: input, shape index: {}]   ;;  %s2005_s7 = inlined_call_operand.hbm [shape: f32[8,128], index: 7, kind: output, shape index: {}]  }
   0x1   :  { %v12_v0 = vstv %s2004_s6 }
   0x2   :  { %13 = vst [vmem:[#allocation3] sm:$0x1] %v12_v0 }
   0x3   :  { %14 = vsyncpa [#allocation5], 0 }
   0x4   :  { %15 = vsyncpa [#allocation8], 0 }
   0x5   :  { %16 = vsyncpa [#allocation6], 0  ;;  %s25_s28 = sshll.u32 %s1998_s0, 4  ;;  %s1342_s29 = smov [#allocation4]   ;;  %s26_s28 = int_to_ptr.hbm [resolvable:$true] %s25_s28 }
   0x6   :  { %s27_s30 = sshll.u32 %s1342_s29, 4  ;;  %s42_s10 = sshll.u32 %s1999_s1, 4  ;;  %s28_s30 = int_to_ptr.vmem [resolvable:$true] %s27_s30  ;;  %s43_s10 = int_to_ptr.hbm [resolvable:$true] %s42_s10 }
   0x7   :  { %s1343_s11 = smov 64   ;;  %s1344_s12 = smov 4  }
   0x8   :  { %33 = dma.hbm_to_vmem [thread:$0]  %s26_s28, 768, %s28_s30, [#allocation5], %s1343_s11, %s1343_s11, %s1344_s12  }
   0x9   :  { %s1345_s6 = smov [#allocation7]  }
   0xa   :  { %s44_s13 = sshll.u32 %s1345_s6, 4  ;;  %s45_s13 = int_to_ptr.vmem [resolvable:$true] %s44_s13 }
   0xb   :  { %50 = dma.hbm_to_vmem [thread:$0]  %s43_s10, 768, %s45_s13, [#allocation8], %s1343_s11, %s1343_s11, %s1344_s12  }
   0xc   :  { %1336 = dma.done.wait [#allocation5], 768  }
   0xd   :  { %1337 = vsyncadd [#allocation5], 4294966528 }
   0xe   :  { %1338 = dma.done.wait [#allocation8], 768  }
   0xf   :  { %1339 = vsyncadd [#allocation8], 4294966528  ;;  %v1120_v1 = vld [vmem:[%s2001_s3 + $0x38] sm:$0xff]  ;;  %v1119_v2 = vld [vmem:[%s2001_s3 + $0x30] sm:$0xff]  ;;  %vm964_vm2 = vcmask 7168   ;;  %s1016_s18 = sshll.u32 %s2005_s7, 4  ;;  %s1017_s18 = int_to_ptr.hbm [resolvable:$true] %s1016_s18 }
  0x10   :  { %219 = vmatpush.bf16.msra.mxu0 %v1120_v1  ;;  %1133 = vmatpush.bf16.msra.mxu2 %v1120_v1  ;;  %v1118_v3 = vld [vmem:[%s2001_s3 + $0x28] sm:$0xff]  ;;  %v1117_v4 = vld [vmem:[%s2001_s3 + $0x20] sm:$0xff]  ;;  %v1116_v5 = vld [vmem:[%s2001_s3 + $0x18] sm:$0xff] }
  0x11   :  { %372 = vmatpush.bf16.msra.mxu1 %v1120_v1  ;;  %1141 = vmatpush.bf16.msra.mxu3 %v1120_v1  ;;  %v1115_v6 = vld [vmem:[%s2001_s3 + $0x10] sm:$0xff]  ;;  %v1114_v7 = vld [vmem:[%s2001_s3 + $0x8] sm:$0xff]  ;;  %v1113_v8 = vld [vmem:[%s2001_s3] sm:$0xff]  ;;  %s1346_s3 = smov 127  }
  0x12   :  { %v1121_v9 = vld [vmem:[#allocation4] sm:$0xff]  ;;  %v1124_v10 = vld [vmem:[#allocation4 + $0x18] sm:$0xff]  ;;  %v1127_v11 = vld [vmem:[#allocation7] sm:$0xff] }
  0x13   :  { %v1130_v12 = vld [vmem:[#allocation7 + $0x18] sm:$0xff]  ;;  %v1433_v14 = vld [vmem:[%s2000_s2] sm:$0xff]  ;;  %v474_v17 = vld [vmem:[%s2000_s2 + $0x18] sm:$0xff] }
  0x14   :  { %220 = vmatpush.bf16.msra.mxu0 %v1119_v2  ;;  %1134 = vmatpush.bf16.msra.mxu2 %v1119_v2  ;;  %v1426_v13 = vld [vmem:[%s2000_s2 + $0x8] sm:$0xff]  ;;  %v473_v15 = vld [vmem:[%s2000_s2 + $0x10] sm:$0xff]  ;;  %v475_v18 = vld [vmem:[%s2000_s2 + $0x20] sm:$0xff] }
  0x15   :  { %373 = vmatpush.bf16.msra.mxu1 %v1119_v2  ;;  %1142 = vmatpush.bf16.msra.mxu3 %v1119_v2  ;;  %v476_v16 = vld [vmem:[%s2000_s2 + $0x28] sm:$0xff]  ;;  %v1128_v21 = vld [vmem:[#allocation7 + $0x8] sm:$0xff]  ;;  %v1131_v22 = vld [vmem:[#allocation7 + $0x20] sm:$0xff] }
  0x16   :  { %905 = vrot.lane.b32.xlu1 %v1426_v13, %s1346_s3  ;;  %903 = vrot.lane.b32.xlu0 %v1433_v14, %s1346_s3  ;;  %v1122_v19 = vld [vmem:[#allocation4 + $0x8] sm:$0xff]  ;;  %v1125_v20 = vld [vmem:[#allocation4 + $0x20] sm:$0xff]  ;;  %v1466_v25 = vld [vmem:[%s2000_s2 + $0x38] sm:$0xff] }
  0x17   :  { %907 = vrot.lane.b32.xlu2 %v473_v15, %s1346_s3  ;;  %v1456_v23 = vld [vmem:[%s2000_s2 + $0x40] sm:$0xff]  ;;  %v1461_v24 = vld [vmem:[%s2000_s2 + $0x30] sm:$0xff] }
  0x18   :  { %221 = vmatpush.bf16.msra.mxu0 %v1118_v3  ;;  %1135 = vmatpush.bf16.msra.mxu2 %v1118_v3  ;;  %v1123_v26 = vld [vmem:[#allocation4 + $0x10] sm:$0xff]  ;;  %v1126_v27 = vld [vmem:[#allocation4 + $0x28] sm:$0xff]  ;;  %v1129_v28 = vld [vmem:[#allocation7 + $0x10] sm:$0xff] }
  0x19   :  { %374 = vmatpush.bf16.msra.mxu1 %v1118_v3  ;;  %1143 = vmatpush.bf16.msra.mxu3 %v1118_v3  ;;  %v1132_v29 = vld [vmem:[#allocation7 + $0x28] sm:$0xff] }
  0x1a   :  { %v1477_v30 = vld [vmem:[%s2002_s4] ss:$0 sm:$0xff] }
  0x1b   :  { %v1483_v34 = vld [vmem:[%s2003_s5] ss:$0 sm:$0xff] }
  0x1c   :  { %222 = vmatpush.bf16.msra.mxu0 %v1117_v4  ;;  %1136 = vmatpush.bf16.msra.mxu2 %v1117_v4 }
  0x1d   :  { %375 = vmatpush.bf16.msra.mxu1 %v1117_v4  ;;  %1144 = vmatpush.bf16.msra.mxu3 %v1117_v4 }
  0x1e   :  { %913 = vrot.lane.b32.xlu1 %v476_v16, %s1346_s3  ;;  %909 = vrot.lane.b32.xlu0 %v474_v17, %s1346_s3 }
  0x1f   :  { %911 = vrot.lane.b32.xlu2 %v475_v18, %s1346_s3 }
  0x20   :  { %223 = vmatpush.bf16.msra.mxu0 %v1116_v5  ;;  %1137 = vmatpush.bf16.msra.mxu2 %v1116_v5 }
  0x21   :  { %376 = vmatpush.bf16.msra.mxu1 %v1116_v5  ;;  %1145 = vmatpush.bf16.msra.mxu3 %v1116_v5 }
  0x24   :  { %224 = vmatpush.bf16.msra.mxu0 %v1115_v6  ;;  %1138 = vmatpush.bf16.msra.mxu2 %v1115_v6 }
  0x25   :  { %377 = vmatpush.bf16.msra.mxu1 %v1115_v6  ;;  %1146 = vmatpush.bf16.msra.mxu3 %v1115_v6 }
  0x26   :  { %919 = vrot.lane.b32.xlu1 %v1456_v23, %s1346_s3  ;;  %915 = vrot.lane.b32.xlu0 %v1461_v24, %s1346_s3 }
  0x27   :  { %917 = vrot.lane.b32.xlu2 %v1466_v25, %s1346_s3 }
  0x28   :  { %225 = vmatpush.bf16.msra.mxu0 %v1114_v7  ;;  %1139 = vmatpush.bf16.msra.mxu2 %v1114_v7 }
  0x29   :  { %378 = vmatpush.bf16.msra.mxu1 %v1114_v7  ;;  %1147 = vmatpush.bf16.msra.mxu3 %v1114_v7 }
  0x2c   :  { %226 = vmatpush.bf16.msra.mxu0 %v1113_v8  ;;  %1140 = vmatpush.bf16.msra.mxu2 %v1113_v8 }
  0x2d   :  { %379 = vmatpush.bf16.msra.mxu1 %v1113_v8  ;;  %1148 = vmatpush.bf16.msra.mxu3 %v1113_v8 }
  0x2f   :  { %227 = vmatmul.bf16.vlgmr.msra.gmra.mxu0 %v1121_v9  ;;  %242 = vmatmul.bf16.vlgmr.msra.gmra.mxu2 %v1124_v10 }
  0x30   :  { %380 = vmatmul.bf16.vlgmr.msra.gmra.mxu1 %v1127_v11  ;;  %395 = vmatmul.bf16.vlgmr.msra.gmra.mxu3 %v1130_v12 }
  0x3f   :  { %232 = vmatmul.bf16.gmra.mxu0 %v1122_v19  ;;  %247 = vmatmul.bf16.gmra.mxu2 %v1125_v20 }
  0x40   :  { %385 = vmatmul.bf16.gmra.mxu1 %v1128_v21  ;;  %400 = vmatmul.bf16.gmra.mxu3 %v1131_v22 }
  0x4f   :  { %237 = vmatmul.bf16.gmra.mxu0 %v1123_v26  ;;  %252 = vmatmul.bf16.gmra.mxu2 %v1126_v27 }
  0x50   :  { %390 = vmatmul.bf16.gmra.mxu1 %v1129_v28  ;;  %405 = vmatmul.bf16.gmra.mxu3 %v1132_v29 }
  0xac   :  { %v228_v31 = vpop.f32.mrf.mxu0 }
  0xad   :  { %v229_v32 = vadd.f32 %v1477_v30, %v228_v31  ;;  %v381_v33 = vpop.f32.mrf.mxu1 }
  0xae   :  { %v382_v35 = vadd.f32 %v1477_v30, %v381_v33 }
  0xaf   :  { %v258_v36 = vmax.f32 %v229_v32, 0.0 }
  0xb0   :  { %v411_v37 = vmax.f32 %v382_v35, 0.0 }
  0xb1   :  { %v273_v38 = vmul.f32 %v1483_v34, %v258_v36 }
  0xb2   :  { %v243_v39 = vpop.f32.mrf.mxu2  ;;  %v423_v40 = vmul.f32 %v1483_v34, %v411_v37 }
  0xb3   :  { %v244_v41 = vadd.f32 %v1477_v30, %v243_v39  ;;  %v396_v42 = vpop.f32.mrf.mxu3  ;;  %285 = vadd.xlane.f32.xlu0 %v273_v38 }
  0xb4   :  { %435 = vadd.xlane.f32.xlu1 %v423_v40  ;;  %v230_v43 = vpop.f32.mrf.mxu0  ;;  %v397_v45 = vadd.f32 %v1477_v30, %v396_v42 }
  0xb5   :  { %v264_v44 = vmax.f32 %v244_v41, 0.0  ;;  %v231_v46 = vadd.f32 %v1477_v30, %v230_v43  ;;  %v383_v47 = vpop.f32.mrf.mxu1 }
  0xb6   :  { %v417_v50 = vmax.f32 %v397_v45, 0.0  ;;  %v384_v60 = vadd.f32 %v1477_v30, %v383_v47 }
  0xb7   :  { %v259_v48 = vmax.f32 %v231_v46, 0.0  ;;  %v279_v49 = vmul.f32 %v1483_v34, %v264_v44 }
  0xb8   :  { %v429_v58 = vmul.f32 %v1483_v34, %v417_v50  ;;  %v412_v2 = vmax.f32 %v384_v60, 0.0 }
  0xb9   :  { %297 = vadd.xlane.f32.xlu2 %v279_v49  ;;  %v274_v51 = vmul.f32 %v1483_v34, %v259_v48 }
  0xba   :  { %v245_v52 = vpop.f32.mrf.mxu2  ;;  %v424_v12 = vmul.f32 %v1483_v34, %v412_v2 }
  0xbb   :  { %v246_v53 = vadd.f32 %v1477_v30, %v245_v52  ;;  %287 = vadd.xlane.f32.xlu0 %v274_v51  ;;  %v398_v54 = vpop.f32.mrf.mxu3 }
  0xbc   :  { %v233_v55 = vpop.f32.mrf.mxu0  ;;  %v399_v61 = vadd.f32 %v1477_v30, %v398_v54 }
  0xbd   :  { %v265_v56 = vmax.f32 %v246_v53, 0.0  ;;  %v386_v57 = vpop.f32.mrf.mxu1  ;;  %v234_v8 = vadd.f32 %v1477_v30, %v233_v55 }
  0xbe   :  { %v387_v59 = vadd.f32 %v1477_v30, %v386_v57  ;;  %v418_v3 = vmax.f32 %v399_v61, 0.0 }
  0xbf   :  { %v280_v62 = vmul.f32 %v1483_v34, %v265_v56  ;;  %v260_v17 = vmax.f32 %v234_v8, 0.0  ;;  %v481_v8 = vld [vmem:[%s2000_s2 + $0x50] sm:$0xff] }
  0xc0   :  { %v413_v63 = vmax.f32 %v387_v59, 0.0  ;;  %v430_v11 = vmul.f32 %v1483_v34, %v418_v3 }
  0xc1   :  { %299 = vadd.xlane.f32.xlu1 %v280_v62  ;;  %447 = vadd.xlane.f32.xlu2 %v429_v58  ;;  %v275_v29 = vmul.f32 %v1483_v34, %v260_v17 }
  0xc2   :  { %v248_v0 = vpop.f32.mrf.mxu2  ;;  %v425_v1 = vmul.f32 %v1483_v34, %v413_v63 }
  0xc3   :  { %v249_v4 = vadd.f32 %v1477_v30, %v248_v0  ;;  %v401_v10 = vpop.f32.mrf.mxu3 }
  0xc4   :  { %439 = vadd.xlane.f32.xlu0 %v425_v1  ;;  %v235_v5 = vpop.f32.mrf.mxu0  ;;  %v402_v15 = vadd.f32 %v1477_v30, %v401_v10  ;;  %v1548_v10 = vpop.permute.xlu2 %907 }
  0xc5   :  { %v266_v6 = vmax.f32 %v249_v4, 0.0  ;;  %v388_v7 = vpop.f32.mrf.mxu1  ;;  %v236_v9 = vadd.f32 %v1477_v30, %v235_v5 }
  0xc6   :  { %v419_v19 = vmax.f32 %v402_v15, 0.0  ;;  %v389_v26 = vadd.f32 %v1477_v30, %v388_v7  ;;  %v480_v7 = vld [vmem:[%s2000_s2 + $0x48] sm:$0xff] }
  0xc7   :  { %v281_v16 = vmul.f32 %v1483_v34, %v266_v6  ;;  %v261_v18 = vmax.f32 %v236_v9, 0.0  ;;  %v1542_v9 = vpop.permute.xlu0 %903 }
  0xc8   :  { %v431_v31 = vmul.f32 %v1483_v34, %v419_v19  ;;  %v414_v32 = vmax.f32 %v389_v26, 0.0 }
  0xc9   :  { %449 = vadd.xlane.f32.xlu1 %v430_v11  ;;  %437 = vadd.xlane.f32.xlu2 %v424_v12  ;;  %v276_v28 = vmul.f32 %v1483_v34, %v261_v18  ;;  %v1560_v18 = vld [vmem:[#allocation3] ss:$0 sm:$0xff] }
  0xca   :  { %v250_v21 = vpop.f32.mrf.mxu2  ;;  %v426_v39 = vmul.f32 %v1483_v34, %v414_v32 }
  0xcb   :  { %v403_v33 = vpop.f32.mrf.mxu3  ;;  %v251_v40 = vadd.f32 %v1477_v30, %v250_v21 }
  0xcc   :  { %301 = vadd.xlane.f32.xlu0 %v281_v16  ;;  %v238_v20 = vpop.f32.mrf.mxu0  ;;  %v404_v52 = vadd.f32 %v1477_v30, %v403_v33  ;;  %v1554_v15 = vpop.permute.xlu2 %911 }
  0xcd   :  { %v391_v22 = vpop.f32.mrf.mxu1  ;;  %v239_v27 = vadd.f32 %v1477_v30, %v238_v20  ;;  %v267_v48 = vmax.f32 %v251_v40, 0.0 }
  0xce   :  { %v392_v41 = vadd.f32 %v1477_v30, %v391_v22  ;;  %v420_v59 = vmax.f32 %v404_v52, 0.0 }
  0xcf   :  { %v262_v35 = vmax.f32 %v239_v27, 0.0  ;;  %v282_v53 = vmul.f32 %v1483_v34, %v267_v48  ;;  %v1550_v11 = vpop.permute.xlu0 %909 }
  0xd0   :  { %v415_v49 = vmax.f32 %v392_v41, 0.0  ;;  %v432_v1 = vmul.f32 %v1483_v34, %v420_v59 }
  0xd1   :  { %291 = vadd.xlane.f32.xlu2 %v276_v28  ;;  %289 = vadd.xlane.f32.xlu1 %v275_v29  ;;  %v277_v44 = vmul.f32 %v1483_v34, %v262_v35 }
  0xd2   :  { %v253_v38 = vpop.f32.mrf.mxu2  ;;  %v427_v54 = vmul.f32 %v1483_v34, %v415_v49 }
  0xd3   :  { %v406_v47 = vpop.f32.mrf.mxu3  ;;  %v254_v50 = vadd.f32 %v1477_v30, %v253_v38 }
  0xd4   :  { %451 = vadd.xlane.f32.xlu0 %v431_v31  ;;  %v240_v36 = vpop.f32.mrf.mxu0  ;;  %v407_v63 = vadd.f32 %v1477_v30, %v406_v47  ;;  %v1562_v19 = vpop.permute.xlu2 %917 }
  0xd5   :  { %v241_v37 = vadd.f32 %v1477_v30, %v240_v36  ;;  %v393_v43 = vpop.f32.mrf.mxu1  ;;  %v268_v56 = vmax.f32 %v254_v50, 0.0 }
  0xd6   :  { %v394_v46 = vadd.f32 %v1477_v30, %v393_v43  ;;  %v421_v3 = vmax.f32 %v407_v63, 0.0 }
  0xd7   :  { %v263_v42 = vmax.f32 %v241_v37, 0.0  ;;  %v283_v61 = vmul.f32 %v1483_v34, %v268_v56  ;;  %v1556_v16 = vpop.permute.xlu0 %915 }
  0xd8   :  { %v416_v51 = vmax.f32 %v394_v46, 0.0  ;;  %v433_v6 = vmul.f32 %v1483_v34, %v421_v3 }
  0xd9   :  { %441 = vadd.xlane.f32.xlu2 %v426_v39  ;;  %293 = vadd.xlane.f32.xlu1 %v277_v44  ;;  %v278_v45 = vmul.f32 %v1483_v34, %v263_v42 }
  0xda   :  { %v255_v55 = vpop.f32.mrf.mxu2  ;;  %v428_v58 = vmul.f32 %v1483_v34, %v416_v51 }
  0xdb   :  { %v256_v57 = vadd.f32 %v1477_v30, %v255_v55  ;;  %v408_v60 = vpop.f32.mrf.mxu3 }
  0xdc   :  { %295 = vadd.xlane.f32.xlu0 %v278_v45  ;;  %v409_v0 = vadd.f32 %v1477_v30, %v408_v60  ;;  %v482_v30 = vld [vmem:[%s2000_s2 + $0x58] sm:$0xff] }
  0xdd   :  { %v269_v62 = vmax.f32 %v256_v57, 0.0 }
  0xde   :  { %v422_v4 = vmax.f32 %v409_v0, 0.0 }
  0xdf   :  { %v284_v2 = vmul.f32 %v1483_v34, %v269_v62 }
  0xe0   :  { %v434_v5 = vmul.f32 %v1483_v34, %v422_v4  ;;  %v1546_v34 = vpop.permute.xlu1 %905 }
  0xe1   :  { %303 = vadd.xlane.f32.xlu2 %v282_v53  ;;  %443 = vadd.xlane.f32.xlu1 %v427_v54 }
  0xe4   :  { %445 = vadd.xlane.f32.xlu0 %v428_v58 }
  0xe8   :  { %v1552_v12 = vpop.permute.xlu1 %913 }
  0xe9   :  { %453 = vadd.xlane.f32.xlu2 %v432_v1  ;;  %305 = vadd.xlane.f32.xlu1 %v283_v61 }
  0xec   :  { %307 = vadd.xlane.f32.xlu0 %v284_v2 }
  0xf0   :  { %v1558_v17 = vpop.permute.xlu1 %919 }
  0xf1   :  { %457 = vadd.xlane.f32.xlu2 %v434_v5  ;;  %455 = vadd.xlane.f32.xlu1 %v433_v6 }
 0x100   :  { %921 = vrot.lane.b32.xlu0 %v480_v7, %s1346_s3 }
 0x109   :  { %923 = vrot.lane.b32.xlu2 %v481_v8, %s1346_s3 }
 0x10a   :  { %925 = vrot.lane.b32.xlu1 %v482_v30, %s1346_s3 }
 0x126   :  { %v286_v20 = vpop.xlane.xlu0 %285 }
 0x127   :  { %v436_v21 = vpop.xlane.xlu1 %435  ;;  %v1565_v22 = vadd.f32 %v1560_v18, %v286_v20 }
 0x128   :  { %v1568_v26 = vadd.f32 %v1560_v18, %v436_v21 }
 0x129   :  { %v483_v27 = vsub.f32 0.0, %v1565_v22 }
 0x12a   :  { %v711_v28 = vand.u32 2147483647, %v1568_v26  ;;  %v699_v22 = vmax.f32 %v1568_v26, 0.0 }
 0x12b   :  { %v507_v29 = vand.u32 2147483647, %v483_v27 }
 0x12c   :  { %v723_v31 = vsub.f32 0.0, %v711_v28  ;;  %v298_v32 = vpop.xlane.xlu2 %297 }
 0x12d   :  { %v519_v33 = vsub.f32 0.0, %v507_v29  ;;  %v1575_v35 = vadd.f32 %v1560_v18, %v298_v32 }
 0x12e   :  { %v735_v36 = vmul.f32 1.442695, %v723_v31  ;;  %v288_v37 = vpop.xlane.xlu0 %287 }
 0x12f   :  { %v531_v38 = vmul.f32 1.442695, %v519_v33  ;;  %v489_v39 = vsub.f32 0.0, %v1575_v35  ;;  %v1579_v40 = vadd.f32 %v1560_v18, %v288_v37 }
 0x130   :  { %1161 = vpow2.f32 %v735_v36 }
 0x131   :  { %1163 = vpow2.f32 %v531_v38  ;;  %v513_v41 = vand.u32 2147483647, %v489_v39  ;;  %v484_v42 = vsub.f32 0.0, %v1579_v40 }
 0x133   :  { %v525_v43 = vsub.f32 0.0, %v513_v41  ;;  %v508_v44 = vand.u32 2147483647, %v484_v42 }
 0x134   :  { %v300_v45 = vpop.xlane.xlu1 %299  ;;  %v448_v49 = vpop.xlane.xlu2 %447 }
 0x135   :  { %v543_v46 = vmul.f32 1.442695, %v525_v43  ;;  %v520_v47 = vsub.f32 0.0, %v508_v44  ;;  %v1587_v48 = vadd.f32 %v1560_v18, %v300_v45  ;;  %v1590_v56 = vadd.f32 %v1560_v18, %v448_v49 }
 0x136   :  { %v1162_v50 = vpop.eup %1161  ;;  %v495_v43 = vmax.f32 %v483_v27, 0.0 }
 0x137   :  { %v1164_v51 = vpop.eup %1163  ;;  %v759_v52 = vadd.f32 1.0, %v1162_v50  ;;  %1165 = vpow2.f32 %v543_v46  ;;  %v533_v55 = vmul.f32 1.442695, %v520_v47  ;;  %v490_v57 = vsub.f32 0.0, %v1587_v48  ;;  %v440_v58 = vpop.xlane.xlu0 %439 }
 0x138   :  { %v555_v53 = vadd.f32 1.0, %v1164_v51  ;;  %v558_v54 = vmul.f32 -0.5, %v1164_v51  ;;  %v762_v59 = vmul.f32 -0.5, %v1162_v50  ;;  %v717_v62 = vand.u32 2147483647, %v1590_v56 }
 0x139   :  { %1167 = vlog2.f32 %v759_v52  ;;  %v514_v60 = vand.u32 2147483647, %v490_v57  ;;  %v1597_v63 = vadd.f32 %v1560_v18, %v440_v58  ;;  %v561_v4 = vand.u32 2147483647, %v1164_v51 }
 0x13a   :  { %1169 = vlog2.f32 %v555_v53  ;;  %v559_v61 = vadd.f32 1.0, %v558_v54  ;;  %v763_v3 = vadd.f32 1.0, %v762_v59  ;;  %v729_v6 = vsub.f32 0.0, %v717_v62 }
 0x13b   :  { %1171 = vpow2.f32 %v533_v55  ;;  %v526_v1 = vsub.f32 0.0, %v514_v60  ;;  %v765_v30 = vand.u32 2147483647, %v1162_v50  ;;  %v713_v20 = vand.u32 2147483647, %v1597_v63 }
 0x13c   :  { %v450_v2 = vpop.xlane.xlu1 %449  ;;  %v560_v29 = vmul.f32 %v1164_v51, %v559_v61  ;;  %v438_v32 = vpop.xlane.xlu2 %437  ;;  %v747_v37 = vmul.f32 1.442695, %v729_v6  ;;  %v764_v41 = vmul.f32 %v1162_v50, %v763_v3  ;;  %vm562_vm0 = vcmp.lt.f32.partialorder %v561_v4, 0.0004427343 }
 0x13d   :  { %v1599_v0 = vpop.eup %1165  ;;  %v545_v8 = vmul.f32 1.442695, %v526_v1  ;;  %v1604_v31 = vadd.f32 %v1560_v18, %v450_v2  ;;  %v725_v38 = vsub.f32 0.0, %v713_v20  ;;  %vm1608_vm1 = vcmp.lt.f32.partialorder %v765_v30, 0.0004427343 }
 0x13e   :  { %v609_v5 = vadd.f32 1.0, %v1599_v0  ;;  %v1613_v47 = vadd.f32 %v1560_v18, %v438_v32  ;;  %v612_v51 = vmul.f32 -0.5, %v1599_v0  ;;  %v615_v55 = vand.u32 2147483647, %v1599_v0 }
 0x13f   :  { %v1168_v7 = vpop.eup %1167  ;;  %v739_v50 = vmul.f32 1.442695, %v725_v38  ;;  %v718_v53 = vand.u32 2147483647, %v1604_v31  ;;  %v302_v58 = vpop.xlane.xlu0 %301  ;;  %v501_v4 = vmax.f32 %v489_v39, 0.0  ;;  %v496_v20 = vmax.f32 %v484_v42, 0.0 }
 0x140   :  { %v1170_v21 = vpop.eup %1169  ;;  %v761_v28 = vmul.f32 0.6931472, %v1168_v7  ;;  %1173 = vlog2.f32 %v609_v5  ;;  %v712_v61 = vand.u32 2147483647, %v1613_v47  ;;  %v613_v62 = vadd.f32 1.0, %v612_v51 }
 0x141   :  { %v1172_v33 = vpop.eup %1171  ;;  %v557_v36 = vmul.f32 0.6931472, %v1170_v21  ;;  %1175 = vpow2.f32 %v545_v8  ;;  %v730_v2 = vsub.f32 0.0, %v718_v53  ;;  %v1630_v6 = vadd.f32 %v1560_v18, %v302_v58 }
 0x142   :  { %v564_v44 = vadd.f32 1.0, %v1172_v33  ;;  %1177 = vpow2.f32 %v747_v37  ;;  %v767_v49 = vsel %vm1608_vm1, %v764_v41, %v761_v28  ;;  %v567_v52 = vmul.f32 -0.5, %v1172_v33 }
 0x143   :  { %v563_v46 = vsel %vm562_vm0, %v560_v29, %v557_v36  ;;  %v867_v60 = vadd.f32 %v767_v49, %v699_v22  ;;  %vm1632_vm3 = vcmp.lt.f32.partialorder %v615_v55, 0.0004427343  ;;  %v705_v21 = vmax.f32 %v1590_v56, 0.0 }
 0x144   :  { %1179 = vlog2.f32 %v564_v44  ;;  %v663_v27 = vadd.f32 %v563_v46, %v495_v43  ;;  %v568_v5 = vadd.f32 1.0, %v567_v52  ;;  %v570_v29 = vand.u32 2147483647, %v1172_v33  ;;  %v292_v42 = vpop.xlane.xlu2 %291 }
 0x145   :  { %1181 = vpow2.f32 %v739_v50  ;;  %v879_v28 = vmin.f32 %v867_v60, 100.0  ;;  %v724_v39 = vsub.f32 0.0, %v712_v61  ;;  %v614_v36 = vmul.f32 %v1599_v0, %v613_v62 }
 0x146   :  { %v1174_v54 = vpop.eup %1173  ;;  %v675_v26 = vmin.f32 %v663_v27, 100.0  ;;  %v749_v38 = vmul.f32 1.442695, %v730_v2  ;;  %v569_v43 = vmul.f32 %v1172_v33, %v568_v5  ;;  %v491_v40 = vsub.f32 0.0, %v1630_v6 }
 0x147   :  { %v1621_v59 = vpop.eup %1175  ;;  %v611_v30 = vmul.f32 0.6931472, %v1174_v54  ;;  %v939_v0 = vmul.f32 %v1542_v9, %v879_v28  ;;  %vm1651_vm4 = vcmp.lt.f32.partialorder %v570_v29, 0.0004427343  ;;  %v737_v33 = vmul.f32 1.442695, %v724_v39  ;;  %v290_v54 = vpop.xlane.xlu1 %289 }
 0x148   :  { %v618_v1 = vadd.f32 1.0, %v1621_v59  ;;  %v1625_v3 = vpop.eup %1177  ;;  %v687_v41 = vmul.f32 %v675_v26, %v1433_v14  ;;  %v621_v45 = vmul.f32 -0.5, %v1621_v59  ;;  %v1657_v14 = vmax.f32 %v490_v57, 0.0  ;;  %v452_v57 = vpop.xlane.xlu0 %451 }
 0x149   :  { %v813_v35 = vadd.f32 1.0, %v1625_v3  ;;  %v617_v44 = vsel %vm1632_vm3, %v614_v36, %v611_v30  ;;  %v816_v46 = vmul.f32 -0.5, %v1625_v3  ;;  %v624_v22 = vand.u32 2147483647, %v1621_v59 }
 0x14a   :  { %v1180_v7 = vpop.eup %1179  ;;  %1183 = vlog2.f32 %v618_v1  ;;  %v701_v27 = vmax.f32 %v1597_v63, 0.0  ;;  %v951_v52 = vadd.f32 %v939_v0, %v687_v41  ;;  %v669_v53 = vadd.f32 %v617_v44, %v501_v4 }
 0x14b   :  { %v1640_v32 = vpop.eup %1181  ;;  %v566_v37 = vmul.f32 0.6931472, %v1180_v7  ;;  %1185 = vlog2.f32 %v813_v35  ;;  %v515_v9 = vand.u32 2147483647, %v491_v40  ;;  %v622_v58 = vadd.f32 1.0, %v621_v45 }
 0x14c   :  { %v777_v49 = vadd.f32 1.0, %v1640_v32  ;;  %1187 = vpow2.f32 %v749_v38  ;;  %v817_v60 = vadd.f32 1.0, %v816_v46  ;;  %v819_v48 = vand.u32 2147483647, %v1625_v3  ;;  %v442_v45 = vpop.xlane.xlu2 %441 }
 0x14d   :  { %v572_v50 = vsel %vm1651_vm4, %v569_v43, %v566_v37  ;;  %1189 = vpow2.f32 %v737_v33  ;;  %v706_v1 = vmax.f32 %v1604_v31, 0.0  ;;  %v700_v2 = vmax.f32 %v1613_v47, 0.0 }
 0x14e   :  { %1191 = vlog2.f32 %v777_v49  ;;  %v664_v62 = vadd.f32 %v572_v50, %v496_v20  ;;  %v527_v26 = vsub.f32 0.0, %v515_v9  ;;  %vm1666_vm5 = vcmp.lt.f32.partialorder %v624_v22, 0.0004427343 }
 0x14f   :  { %v780_v6 = vmul.f32 -0.5, %v1640_v32  ;;  %v1672_v7 = vadd.f32 %v1560_v18, %v292_v42  ;;  %v1675_v30 = vsel %vm964_vm2, %v951_v52, 0.0  ;;  %v681_v8 = vmin.f32 %v669_v53, 100.0 }
 0x150   :  { %v1184_v55 = vpop.eup %1183  ;;  %v1678_v20 = vadd.f32 %v1560_v18, %v290_v54  ;;  %v1681_v28 = vadd.f32 %v1560_v18, %v452_v57  ;;  %v623_v39 = vmul.f32 %v1621_v59, %v622_v58  ;;  %v818_v36 = vmul.f32 %v1625_v3, %v817_v60  ;;  %v296_v5 = vpop.xlane.xlu0 %295 }
 0x151   :  { %v1186_v61 = vpop.eup %1185  ;;  %v620_v35 = vmul.f32 0.6931472, %v1184_v55  ;;  %vm1687_vm6 = vcmp.lt.f32.partialorder %v819_v48, 0.0004427343  ;;  %v676_v41 = vmin.f32 %v664_v62, 100.0  ;;  %v781_v59 = vadd.f32 1.0, %v780_v6  ;;  %v294_v55 = vpop.xlane.xlu1 %293 }
 0x152   :  { %v815_v4 = vmul.f32 0.6931472, %v1186_v61  ;;  %v1683_v29 = vpop.eup %1187  ;;  %v783_v43 = vand.u32 2147483647, %v1640_v32  ;;  %v547_v44 = vmul.f32 1.442695, %v527_v26  ;;  %v693_v51 = vmul.f32 %v681_v8, %v1461_v24 }
 0x153   :  { %v1691_v38 = vpop.eup %1189  ;;  %v822_v42 = vadd.f32 1.0, %v1683_v29  ;;  %v486_v0 = vsub.f32 0.0, %v1672_v7  ;;  %v485_v33 = vsub.f32 0.0, %v1678_v20  ;;  %v719_v50 = vand.u32 2147483647, %v1681_v28 }
 0x154   :  { %v1192_v46 = vpop.eup %1191  ;;  %v821_v49 = vsel %vm1687_vm6, %v818_v36, %v815_v4  ;;  %v768_v3 = vadd.f32 1.0, %v1691_v38  ;;  %v626_v22 = vsel %vm1666_vm5, %v623_v39, %v620_v35  ;;  %v1704_v52 = vmax.f32 %v491_v40, 0.0 }
 0x155   :  { %1193 = vlog2.f32 %v822_v42  ;;  %v1707_v53 = vadd.f32 %v1560_v18, %v442_v45  ;;  %v873_v9 = vadd.f32 %v821_v49, %v705_v21  ;;  %v779_v54 = vmul.f32 0.6931472, %v1192_v46 }
 0x156   :  { %1195 = vlog2.f32 %v768_v3  ;;  %vm1711_vm7 = vcmp.lt.f32.partialorder %v783_v43, 0.0004427343  ;;  %v1716_v58 = vmul.f32 %v676_v41, %v1426_v13  ;;  %v782_v60 = vmul.f32 %v1640_v32, %v781_v59 }
 0x157   :  { %1197 = vpow2.f32 %v547_v44  ;;  %v825_v40 = vmul.f32 -0.5, %v1683_v29  ;;  %v510_v48 = vand.u32 2147483647, %v486_v0  ;;  %v670_v56 = vadd.f32 %v626_v22, %v1657_v14 }
 0x158   :  { %v509_v21 = vand.u32 2147483647, %v485_v33  ;;  %v707_v57 = vmax.f32 %v1681_v28, 0.0  ;;  %v731_v61 = vsub.f32 0.0, %v719_v50  ;;  %v771_v62 = vmul.f32 -0.5, %v1691_v38 }
 0x159   :  { %v522_v26 = vsub.f32 0.0, %v510_v48  ;;  %v714_v13 = vand.u32 2147483647, %v1707_v53  ;;  %v1729_v32 = vadd.f32 %v1560_v18, %v294_v55  ;;  %v885_v6 = vmin.f32 %v873_v9, 100.0 }
 0x15a   :  { %v785_v14 = vsel %vm1711_vm7, %v782_v60, %v779_v54  ;;  %v521_v8 = vsub.f32 0.0, %v509_v21  ;;  %v751_v35 = vmul.f32 1.442695, %v731_v61  ;;  %v826_v36 = vadd.f32 1.0, %v825_v40 }
 0x15b   :  { %v1194_v4 = vpop.eup %1193  ;;  %v828_v37 = vand.u32 2147483647, %v1683_v29  ;;  %v537_v41 = vmul.f32 1.442695, %v522_v26  ;;  %v726_v43 = vsub.f32 0.0, %v714_v13  ;;  %v487_v45 = vsub.f32 0.0, %v1729_v32  ;;  %v304_v13 = vpop.xlane.xlu2 %303 }
 0x15c   :  { %v1196_v39 = vpop.eup %1195  ;;  %v535_v44 = vmul.f32 1.442695, %v521_v8  ;;  %1199 = vpow2.f32 %v751_v35  ;;  %v1738_v46 = vadd.f32 %v1560_v18, %v296_v5  ;;  %v869_v49 = vadd.f32 %v785_v14, %v701_v27 }
 0x15d   :  { %v1734_v42 = vpop.eup %1197  ;;  %v824_v59 = vmul.f32 0.6931472, %v1194_v4  ;;  %v772_v3 = vadd.f32 1.0, %v771_v62  ;;  %v774_v50 = vand.u32 2147483647, %v1691_v38  ;;  %v945_v22 = vmul.f32 %v1556_v16, %v885_v6 }
 0x15e   :  { %v627_v9 = vadd.f32 1.0, %v1734_v42  ;;  %1201 = vpow2.f32 %v537_v41  ;;  %v741_v54 = vmul.f32 1.442695, %v726_v43  ;;  %v682_v24 = vmin.f32 %v670_v56, 100.0 }
 0x15f   :  { %v827_v55 = vmul.f32 %v1683_v29, %v826_v36  ;;  %v770_v60 = vmul.f32 0.6931472, %v1196_v39  ;;  %v702_v40 = vmax.f32 %v1707_v53, 0.0  ;;  %vm1747_vm8 = vcmp.lt.f32.partialorder %v828_v37, 0.0004427343 }
 0x160   :  { %1203 = vpow2.f32 %v535_v44  ;;  %v511_v63 = vand.u32 2147483647, %v487_v45  ;;  %v488_v27 = vsub.f32 0.0, %v1738_v46  ;;  %v881_v21 = vmin.f32 %v869_v49, 100.0 }
 0x161   :  { %v830_v16 = vsel %vm1747_vm8, %v827_v55, %v824_v59  ;;  %v773_v61 = vmul.f32 %v1691_v38, %v772_v3  ;;  %1205 = vpow2.f32 %v741_v54  ;;  %v957_v29 = vadd.f32 %v945_v22, %v693_v51 }
 0x162   :  { %v1200_v56 = vpop.eup %1199  ;;  %vm1755_vm9 = vcmp.lt.f32.partialorder %v774_v50, 0.0004427343  ;;  %1207 = vlog2.f32 %v627_v9  ;;  %v630_v26 = vmul.f32 -0.5, %v1734_v42  ;;  %v633_v5 = vand.u32 2147483647, %v1734_v42 }
 0x163   :  { %v776_v32 = vsel %vm1755_vm9, %v773_v61, %v770_v60  ;;  %v831_v4 = vadd.f32 1.0, %v1200_v56  ;;  %v523_v6 = vsub.f32 0.0, %v511_v63  ;;  %v1764_v38 = vmul.f32 %v682_v24, %v1466_v25 }
 0x164   :  { %v1202_v14 = vpop.eup %1201  ;;  %v874_v51 = vadd.f32 %v830_v16, %v706_v1  ;;  %v1770_v8 = vmax.f32 %v486_v0, 0.0  ;;  %v512_v35 = vand.u32 2147483647, %v488_v27  ;;  %v1776_v36 = vmax.f32 %v485_v33, 0.0 }
 0x165   :  { %v582_v39 = vadd.f32 1.0, %v1202_v14  ;;  %v834_v37 = vmul.f32 -0.5, %v1200_v56  ;;  %v1779_v41 = vadd.f32 %v1560_v18, %v304_v13  ;;  %v1782_v31 = vsel %vm964_vm2, %v957_v29, 0.0 }
 0x166   :  { %v1204_v25 = vpop.eup %1203  ;;  %v1785_v1 = vmul.f32 %v1548_v10, %v881_v21  ;;  %v868_v7 = vadd.f32 %v776_v32, %v700_v2  ;;  %1209 = vlog2.f32 %v831_v4  ;;  %v631_v20 = vadd.f32 1.0, %v630_v26 }
 0x167   :  { %v1789_v0 = vpop.eup %1205  ;;  %vm1791_vm10 = vcmp.lt.f32.partialorder %v633_v5, 0.0004427343  ;;  %1211 = vlog2.f32 %v582_v39  ;;  %v539_v43 = vmul.f32 1.442695, %v523_v6  ;;  %v886_v49 = vmin.f32 %v874_v51, 100.0 }
 0x168   :  { %v1208_v44 = vpop.eup %1207  ;;  %v585_v59 = vmul.f32 -0.5, %v1202_v14  ;;  %v573_v3 = vadd.f32 1.0, %v1204_v25  ;;  %v524_v50 = vsub.f32 0.0, %v512_v35  ;;  %v576_v10 = vmul.f32 -0.5, %v1204_v25 }
 0x169   :  { %v835_v22 = vadd.f32 1.0, %v834_v37  ;;  %v1795_v9 = vmax.f32 %v487_v45, 0.0  ;;  %v492_v47 = vsub.f32 0.0, %v1779_v41  ;;  %v880_v2 = vmin.f32 %v868_v7, 100.0  ;;  %v444_v45 = vpop.xlane.xlu1 %443 }
 0x16a   :  { %1213 = vlog2.f32 %v573_v3  ;;  %v837_v54 = vand.u32 2147483647, %v1200_v56  ;;  %v786_v24 = vadd.f32 1.0, %v1789_v0  ;;  %v629_v55 = vmul.f32 0.6931472, %v1208_v44 }
 0x16b   :  { %v632_v60 = vmul.f32 %v1734_v42, %v631_v20  ;;  %v588_v48 = vand.u32 2147483647, %v1202_v14  ;;  %1215 = vpow2.f32 %v539_v43  ;;  %v586_v21 = vadd.f32 1.0, %v585_v59 }
 0x16c   :  { %v1210_v63 = vpop.eup %1209  ;;  %1217 = vlog2.f32 %v786_v24  ;;  %v789_v16 = vmul.f32 -0.5, %v1789_v0  ;;  %v541_v61 = vmul.f32 1.442695, %v524_v50  ;;  %v577_v62 = vadd.f32 1.0, %v576_v10  ;;  %v446_v10 = vpop.xlane.xlu0 %445 }
 0x16d   :  { %v1212_v29 = vpop.eup %1211  ;;  %v833_v26 = vmul.f32 0.6931472, %v1210_v63  ;;  %v836_v13 = vmul.f32 %v1200_v56, %v835_v22  ;;  %v516_v32 = vand.u32 2147483647, %v492_v47  ;;  %v579_v4 = vand.u32 2147483647, %v1204_v25 }
 0x16e   :  { %v584_v5 = vmul.f32 0.6931472, %v1212_v29  ;;  %vm1803_vm11 = vcmp.lt.f32.partialorder %v837_v54, 0.0004427343  ;;  %1219 = vpow2.f32 %v541_v61  ;;  %v946_v6 = vmul.f32 %v1562_v19, %v886_v49 }
 0x16f   :  { %v940_v51 = vmul.f32 %v1546_v34, %v880_v2  ;;  %v839_v35 = vsel %vm1803_vm11, %v836_v13, %v833_v26  ;;  %v1812_v39 = vadd.f32 %v1560_v18, %v444_v45  ;;  %v635_v37 = vsel %vm1791_vm10, %v632_v60, %v629_v55 }
 0x170   :  { %v1214_v56 = vpop.eup %1213  ;;  %v587_v7 = vmul.f32 %v1202_v14, %v586_v21  ;;  %v790_v20 = vadd.f32 1.0, %v789_v16  ;;  %v528_v43 = vsub.f32 0.0, %v516_v32  ;;  %vm1818_vm12 = vcmp.lt.f32.partialorder %v588_v48, 0.0004427343  ;;  %v454_v16 = vpop.xlane.xlu2 %453 }
 0x171   :  { %v1816_v44 = vpop.eup %1215  ;;  %v575_v34 = vmul.f32 0.6931472, %v1214_v56  ;;  %v578_v19 = vmul.f32 %v1204_v25, %v577_v62  ;;  %v792_v49 = vand.u32 2147483647, %v1789_v0  ;;  %vm580_vm13 = vcmp.lt.f32.partialorder %v579_v4, 0.0004427343 }
 0x172   :  { %v1218_v3 = vpop.eup %1217  ;;  %v590_v50 = vsel %vm1818_vm12, %v587_v7, %v584_v5  ;;  %v875_v14 = vadd.f32 %v839_v35, %v707_v57  ;;  %v591_v33 = vadd.f32 1.0, %v1816_v44  ;;  %v671_v22 = vadd.f32 %v635_v37, %v1704_v52  ;;  %v306_v5 = vpop.xlane.xlu1 %305 }
 0x173   :  { %v581_v2 = vsel %vm580_vm13, %v578_v19, %v575_v34  ;;  %v788_v54 = vmul.f32 0.6931472, %v1218_v3  ;;  %v715_v24 = vand.u32 2147483647, %v1812_v39  ;;  %v952_v55 = vadd.f32 %v940_v51, %v1716_v58  ;;  %v1258_v34 = vld [vmem:[%s2000_s2 + $0x18] sm:$0xff] }
 0x174   :  { %v1830_v25 = vpop.eup %1219  ;;  %v791_v60 = vmul.f32 %v1789_v0, %v790_v20  ;;  %v1836_v48 = vmax.f32 %v488_v27, 0.0  ;;  %v549_v28 = vmul.f32 1.442695, %v528_v43  ;;  %v666_v57 = vadd.f32 %v590_v50, %v1770_v8  ;;  %v308_v43 = vpop.xlane.xlu0 %307 }
 0x175   :  { %v665_v63 = vadd.f32 %v581_v2, %v1776_v36  ;;  %vm1840_vm14 = vcmp.lt.f32.partialorder %v792_v49, 0.0004427343  ;;  %v1845_v21 = vadd.f32 %v1560_v18, %v446_v10  ;;  %v887_v58 = vmin.f32 %v875_v14, 100.0 }
 0x176   :  { %v794_v0 = vsel %vm1840_vm14, %v791_v60, %v788_v54  ;;  %1221 = vlog2.f32 %v591_v33  ;;  %v600_v46 = vadd.f32 1.0, %v1830_v25  ;;  %v1851_v27 = vadd.f32 %v946_v6, %v1764_v38 }
 0x177   :  { %v683_v8 = vmin.f32 %v671_v22, 100.0  ;;  %v594_v36 = vmul.f32 -0.5, %v1816_v44  ;;  %v727_v61 = vsub.f32 0.0, %v715_v24  ;;  %v966_v45 = vsel %vm964_vm2, %v952_v55, 0.0 }
 0x178   :  { %v1857_v29 = vmax.f32 %v492_v47, 0.0  ;;  %1223 = vpow2.f32 %v549_v28  ;;  %v1860_v62 = vadd.f32 %v1560_v18, %v454_v16  ;;  %v677_v26 = vmin.f32 %v665_v63, 100.0  ;;  %v458_v28 = vpop.xlane.xlu2 %457 }
 0x179   :  { %v870_v13 = vadd.f32 %v794_v0, %v702_v40  ;;  %v743_v38 = vmul.f32 1.442695, %v727_v61  ;;  %v716_v32 = vand.u32 2147483647, %v1845_v21  ;;  %v678_v4 = vmin.f32 %v666_v57, 100.0 }
 0x17a   :  { %v947_v42 = vmul.f32 %v1558_v17, %v887_v58  ;;  %v597_v6 = vand.u32 2147483647, %v1816_v44  ;;  %1225 = vlog2.f32 %v600_v46  ;;  %v967_v41 = vadd.f32 %v966_v45, %v1675_v30  ;;  %v1257_v17 = vld [vmem:[%s2000_s2 + $0x10] sm:$0xff] }
 0x17b   :  { %v695_v47 = vmul.f32 %v683_v8, %v1456_v23  ;;  %v595_v51 = vadd.f32 1.0, %v594_v36  ;;  %1227 = vpow2.f32 %v743_v38  ;;  %v603_v53 = vmul.f32 -0.5, %v1830_v25 }
 0x17c   :  { %v1222_v35 = vpop.eup %1221  ;;  %v606_v40 = vand.u32 2147483647, %v1830_v25  ;;  %v703_v56 = vmax.f32 %v1812_v39, 0.0  ;;  %v1873_v37 = vadd.f32 %v1560_v18, %v306_v5  ;;  %v689_v7 = vmul.f32 %v1257_v17, %v677_v26  ;;  %v1259_v39 = vld [vmem:[%s2000_s2 + $0x20] sm:$0xff] }
 0x17d   :  { %v882_v30 = vmin.f32 %v870_v13, 100.0  ;;  %v704_v23 = vmax.f32 %v1845_v21, 0.0  ;;  %v728_v20 = vsub.f32 0.0, %v716_v32  ;;  %v690_v19 = vmul.f32 %v1258_v34, %v678_v4  ;;  %v456_v13 = vpop.xlane.xlu1 %455 }
 0x17e   :  { %v1879_v59 = vpop.eup %1223  ;;  %v1884_v49 = vadd.f32 %v947_v42, %v695_v47  ;;  %vm1886_vm15 = vcmp.lt.f32.partialorder %v597_v6, 0.0004427343  ;;  %v708_v50 = vmax.f32 %v1860_v62, 0.0  ;;  %v593_v14 = vmul.f32 0.6931472, %v1222_v35 }
 0x17f   :  { %v596_v33 = vmul.f32 %v1816_v44, %v595_v51  ;;  %v745_v10 = vmul.f32 1.442695, %v728_v20  ;;  %v720_v22 = vand.u32 2147483647, %v1860_v62  ;;  %v604_v54 = vadd.f32 1.0, %v603_v53 }
 0x180   :  { %v1226_v2 = vpop.eup %1225  ;;  %vm1893_vm0 = vcmp.lt.f32.partialorder %v606_v40, 0.0004427343  ;;  %v493_v55 = vsub.f32 0.0, %v1873_v37  ;;  %v1899_v60 = vadd.f32 %v1560_v18, %v308_v43  ;;  %v953_v63 = vadd.f32 %v1785_v1, %v689_v7 }
 0x181   :  { %v1228_v57 = vpop.eup %1227  ;;  %v942_v44 = vmul.f32 %v1550_v11, %v882_v30  ;;  %1229 = vpow2.f32 %v745_v10  ;;  %v732_v52 = vsub.f32 0.0, %v720_v22  ;;  %v636_v16 = vadd.f32 1.0, %v1879_v59 }
 0x182   :  { %v639_v58 = vmul.f32 -0.5, %v1879_v59  ;;  %v795_v0 = vadd.f32 1.0, %v1228_v57  ;;  %v798_v46 = vmul.f32 -0.5, %v1228_v57  ;;  %v599_v8 = vsel %vm1886_vm15, %v596_v33, %v593_v14 }
 0x183   :  { %v753_v36 = vmul.f32 1.442695, %v732_v52  ;;  %v494_v61 = vsub.f32 0.0, %v1899_v60  ;;  %v1909_v45 = vadd.f32 %v1560_v18, %v458_v28  ;;  %v602_v1 = vmul.f32 0.6931472, %v1226_v2 }
 0x184   :  { %v605_v11 = vmul.f32 %v1830_v25, %v604_v54  ;;  %1231 = vlog2.f32 %v795_v0  ;;  %v517_v26 = vand.u32 2147483647, %v493_v55  ;;  %v968_v38 = vsel %vm964_vm2, %v953_v63, 0.0 }
 0x185   :  { %v954_v32 = vadd.f32 %v942_v44, %v690_v19  ;;  %v642_v5 = vand.u32 2147483647, %v1879_v59  ;;  %1233 = vpow2.f32 %v753_v36  ;;  %v667_v4 = vadd.f32 %v599_v8, %v1795_v9 }
 0x186   :  { %v799_v42 = vadd.f32 1.0, %v798_v46  ;;  %v529_v6 = vsub.f32 0.0, %v517_v26  ;;  %v518_v47 = vand.u32 2147483647, %v494_v61  ;;  %1235 = vlog2.f32 %v636_v16 }
 0x187   :  { %v1230_v51 = vpop.eup %1229  ;;  %v640_v25 = vadd.f32 1.0, %v639_v58  ;;  %v722_v35 = vand.u32 2147483647, %v1909_v45  ;;  %v1921_v53 = vadd.f32 %v1560_v18, %v456_v13  ;;  %v969_v40 = vadd.f32 %v968_v38, %v967_v41 }
 0x188   :  { %v608_v17 = vsel %vm1893_vm0, %v605_v11, %v602_v1  ;;  %v801_v7 = vand.u32 2147483647, %v1228_v57  ;;  %v804_v30 = vadd.f32 1.0, %v1230_v51  ;;  %v807_v9 = vmul.f32 -0.5, %v1230_v51 }
 0x189   :  { %v551_v20 = vmul.f32 1.442695, %v529_v6  ;;  %v530_v43 = vsub.f32 0.0, %v518_v47  ;;  %v734_v34 = vsub.f32 0.0, %v722_v35  ;;  %v679_v3 = vmin.f32 %v667_v4, 100.0 }
 0x18a   :  { %v1232_v19 = vpop.eup %1231  ;;  %v800_v14 = vmul.f32 %v1228_v57, %v799_v42  ;;  %1237 = vlog2.f32 %v804_v30  ;;  %v721_v33 = vand.u32 2147483647, %v1921_v53  ;;  %v668_v2 = vadd.f32 %v608_v17, %v1836_v48 }
 0x18b   :  { %v1926_v10 = vpop.eup %1233  ;;  %v797_v18 = vmul.f32 0.6931472, %v1232_v19  ;;  %1239 = vpow2.f32 %v551_v20  ;;  %v553_v41 = vmul.f32 1.442695, %v530_v43  ;;  %v757_v22 = vmul.f32 1.442695, %v734_v34 }
 0x18c   :  { %vm1929_vm1 = vcmp.lt.f32.partialorder %v642_v5, 0.0004427343  ;;  %vm802_vm3 = vcmp.lt.f32.partialorder %v801_v7, 0.0004427343  ;;  %v733_v24 = vsub.f32 0.0, %v721_v33  ;;  %v840_v28 = vadd.f32 1.0, %v1926_v10  ;;  %v1236_v57 = vpop.eup %1235 }
 0x18d   :  { %v803_v63 = vsel %vm802_vm3, %v800_v14, %v797_v18  ;;  %v808_v44 = vadd.f32 1.0, %v807_v9  ;;  %v810_v52 = vand.u32 2147483647, %v1230_v51  ;;  %1241 = vpow2.f32 %v553_v41  ;;  %v1260_v9 = vld [vmem:[%s2000_s2 + $0x28] sm:$0xff] }
 0x18e   :  { %v871_v16 = vadd.f32 %v803_v63, %v703_v56  ;;  %1243 = vpow2.f32 %v757_v22  ;;  %v755_v58 = vmul.f32 1.442695, %v733_v24  ;;  %v843_v48 = vmul.f32 -0.5, %v1926_v10 }
 0x18f   :  { %v970_v0 = vsel %vm964_vm2, %v954_v32, 0.0  ;;  %v641_v46 = vmul.f32 %v1879_v59, %v640_v25  ;;  %1245 = vlog2.f32 %v840_v28  ;;  %vm99_vm4 = vcmask 0  }
 0x190   :  { %v1238_v8 = vpop.eup %1237  ;;  %v680_v36 = vmin.f32 %v668_v2, 100.0  ;;  %v883_v1 = vmin.f32 %v871_v16, 100.0  ;;  %1247 = vpow2.f32 %v755_v58  ;;  %v691_v56 = vmul.f32 %v1259_v39, %v679_v3 }
 0x191   :  { %v1240_v11 = vpop.eup %1239  ;;  %v638_v26 = vmul.f32 0.6931472, %v1236_v57  ;;  %v806_v13 = vmul.f32 0.6931472, %v1238_v8  ;;  %v809_v38 = vmul.f32 %v1230_v51, %v808_v44  ;;  %v1347_v5 = vmov 0.0  }
 0x192   :  { %100 = vst.msk [vmem:[#allocation2] sm:$0x1] %vm99_vm4, %v1347_v5  ;;  %v943_v59 = vmul.f32 %v1554_v15, %v883_v1  ;;  %vm811_vm5 = vcmp.lt.f32.partialorder %v810_v52, 0.0004427343  ;;  %v645_v32 = vadd.f32 1.0, %v1240_v11  ;;  %v844_v4 = vadd.f32 1.0, %v843_v48 }
 0x193   :  { %v1242_v42 = vpop.eup %1241  ;;  %v971_v6 = vadd.f32 %v970_v0, %v969_v40  ;;  %v812_v47 = vsel %vm811_vm5, %v809_v38, %v806_v13  ;;  %v648_v25 = vmul.f32 -0.5, %v1240_v11  ;;  %v846_v35 = vand.u32 2147483647, %v1926_v10 }
 0x194   :  { %v1945_v17 = vpop.eup %1243  ;;  %v955_v7 = vadd.f32 %v943_v59, %v691_v56  ;;  %v872_v51 = vadd.f32 %v812_v47, %v704_v23  ;;  %v505_v30 = vmax.f32 %v493_v55, 0.0  ;;  %1249 = vlog2.f32 %v645_v32  ;;  %v922_v56 = vpop.permute.xlu0 %921 }
 0x195   :  { %v1246_v15 = vpop.eup %1245  ;;  %v692_v40 = vmul.f32 %v1260_v9, %v680_v36  ;;  %v644_v20 = vsel %vm1929_vm1, %v641_v46, %v638_v26  ;;  %v654_v43 = vadd.f32 1.0, %v1242_v42  ;;  %v657_v34 = vmul.f32 -0.5, %v1242_v42 }
 0x196   :  { %v1248_v19 = vpop.eup %1247  ;;  %v972_v3 = vsel %vm964_vm2, %v955_v7, 0.0  ;;  %v884_v21 = vmin.f32 %v872_v51, 100.0  ;;  %v842_v23 = vmul.f32 0.6931472, %v1246_v15  ;;  %v845_v37 = vmul.f32 %v1926_v10, %v844_v4 }
 0x197   :  { %v649_v55 = vadd.f32 1.0, %v648_v25  ;;  %v506_v14 = vmax.f32 %v494_v61, 0.0  ;;  %1251 = vlog2.f32 %v654_v43  ;;  %vm847_vm6 = vcmp.lt.f32.partialorder %v846_v35, 0.0004427343 }
 0x198   :  { %v944_v33 = vmul.f32 %v1552_v12, %v884_v21  ;;  %v651_v18 = vand.u32 2147483647, %v1240_v11  ;;  %v848_v41 = vsel %vm847_vm6, %v845_v37, %v842_v23  ;;  %v849_v22 = vadd.f32 1.0, %v1248_v19  ;;  %v926_v23 = vpop.permute.xlu1 %925 }
 0x199   :  { %v973_v2 = vadd.f32 %v972_v3, %v971_v6  ;;  %v658_v54 = vadd.f32 1.0, %v657_v34  ;;  %v852_v24 = vmul.f32 -0.5, %v1248_v19  ;;  %v858_v28 = vadd.f32 1.0, %v1945_v17  ;;  %v924_v34 = vpop.permute.xlu2 %923 }
 0x19a   :  { %v1250_v57 = vpop.eup %1249  ;;  %v956_v63 = vadd.f32 %v944_v33, %v692_v40  ;;  %v876_v10 = vadd.f32 %v848_v41, %v708_v50  ;;  %1253 = vlog2.f32 %v849_v22  ;;  %v861_v60 = vmul.f32 -0.5, %v1945_v17 }
 0x19b   :  { %v647_v61 = vmul.f32 0.6931472, %v1250_v57  ;;  %v650_v44 = vmul.f32 %v1240_v11, %v649_v55  ;;  %v660_v52 = vand.u32 2147483647, %v1242_v42  ;;  %1255 = vlog2.f32 %v858_v28  ;;  %v1262_v55 = vld [vmem:[%s2000_s2 + $0x50] sm:$0xff] }
 0x19c   :  { %v672_v12 = vadd.f32 %v644_v20, %v1857_v29  ;;  %v974_v16 = vsel %vm964_vm2, %v956_v63, 0.0  ;;  %vm1967_vm7 = vcmp.lt.f32.partialorder %v651_v18, 0.0004427343  ;;  %v978_v48 = vsel %vm964_vm2, %v1851_v27, 0.0  ;;  %v1263_v18 = vld [vmem:[%s2000_s2 + $0x58] sm:$0xff] }
 0x19d   :  { %v1252_v62 = vpop.eup %1251  ;;  %v975_v50 = vadd.f32 %v974_v16, %v973_v2  ;;  %v653_v0 = vsel %vm1967_vm7, %v650_v44, %v647_v61  ;;  %v659_v46 = vmul.f32 %v1242_v42, %v658_v54  ;;  %v853_v8 = vadd.f32 1.0, %v852_v24  ;;  %v963_v16 = vld [vmem:[#allocation2] sm:$0x1] }
 0x19e   :  { %v656_v36 = vmul.f32 0.6931472, %v1252_v62  ;;  %v888_v1 = vmin.f32 %v876_v10, 100.0  ;;  %v855_v11 = vand.u32 2147483647, %v1248_v19  ;;  %v862_v29 = vadd.f32 1.0, %v861_v60 }
 0x19f   :  { %vm661_vm8 = vcmp.lt.f32.partialorder %v660_v52, 0.0004427343  ;;  %v977_v39 = vadd.f32 %v1782_v31, %v975_v50  ;;  %v864_v26 = vand.u32 2147483647, %v1945_v17  ;;  %v684_v38 = vmin.f32 %v672_v12, 100.0 }
 0x1a0   :  { %v1254_v13 = vpop.eup %1253  ;;  %v673_v27 = vadd.f32 %v653_v0, %v505_v30  ;;  %v662_v5 = vsel %vm661_vm8, %v659_v46, %v656_v36  ;;  %v709_v59 = vmax.f32 %v1921_v53, 0.0  ;;  %v1348_v32 = vmov 0   ;;  %v1261_v53 = vld [vmem:[%s2000_s2 + $0x48] sm:$0xff]  ;;  %s1349_s2 = smov [#allocation9]  }
 0x1a1   :  { %1157 = vset.pattern.permute.xlu0 %v1348_v32  ;;  %v1256_v4 = vpop.eup %1255  ;;  %v674_v42 = vadd.f32 %v662_v5, %v506_v14  ;;  %v979_v6 = vadd.f32 %v978_v48, %v977_v39  ;;  %v851_v47 = vmul.f32 0.6931472, %v1254_v13  ;;  %v854_v25 = vmul.f32 %v1248_v19, %v853_v8  ;;  %s1014_s1 = sshll.u32 %s1349_s2, 4  ;;  %s1015_s1 = int_to_ptr.vmem [resolvable:$true] %s1014_s1 }
 0x1a2   :  { %v948_v35 = vmul.f32 %v922_v56, %v888_v1  ;;  %vm856_vm9 = vcmp.lt.f32.partialorder %v855_v11, 0.0004427343  ;;  %v860_v7 = vmul.f32 0.6931472, %v1256_v4  ;;  %v863_v31 = vmul.f32 %v1945_v17, %v862_v29 }
 0x1a3   :  { %v710_v51 = vmax.f32 %v1909_v45, 0.0  ;;  %v857_v15 = vsel %vm856_vm9, %v854_v25, %v851_v47  ;;  %vm865_vm10 = vcmp.lt.f32.partialorder %v864_v26, 0.0004427343  ;;  %v685_v30 = vmin.f32 %v673_v27, 100.0 }
 0x1a4   :  { %v696_v9 = vmul.f32 %v1261_v53, %v684_v38  ;;  %v877_v40 = vadd.f32 %v857_v15, %v709_v59  ;;  %v866_v20 = vsel %vm865_vm10, %v863_v31, %v860_v7  ;;  %v686_v43 = vmin.f32 %v674_v42, 100.0 }
 0x1a5   :  { %v878_v19 = vadd.f32 %v866_v20, %v710_v51  ;;  %v980_v3 = vsel %vm964_vm2, %v1884_v49, 0.0  ;;  %v697_v14 = vmul.f32 %v1262_v55, %v685_v30 }
 0x1a6   :  { %v960_v21 = vadd.f32 %v948_v35, %v696_v9  ;;  %v889_v17 = vmin.f32 %v877_v40, 100.0  ;;  %v981_v45 = vadd.f32 %v980_v3, %v979_v6  ;;  %v698_v41 = vmul.f32 %v1263_v18, %v686_v43 }
 0x1a7   :  { %v890_v37 = vmin.f32 %v878_v19, 100.0 }
 0x1a8   :  { %v949_v33 = vmul.f32 %v924_v34, %v889_v17  ;;  %v982_v2 = vsel %vm964_vm2, %v960_v21, 0.0 }
 0x1a9   :  { %v950_v22 = vmul.f32 %v926_v23, %v890_v37  ;;  %v983_v54 = vadd.f32 %v982_v2, %v981_v45 }
 0x1aa   :  { %v961_v49 = vadd.f32 %v949_v33, %v697_v14 }
 0x1ab   :  { %v962_v24 = vadd.f32 %v950_v22, %v698_v41 }
 0x1ac   :  { %v984_v28 = vsel %vm964_vm2, %v961_v49, 0.0 }
 0x1ad   :  { %v985_v57 = vadd.f32 %v984_v28, %v983_v54  ;;  %v986_v63 = vsel %vm964_vm2, %v962_v24, 0.0 }
 0x1af   :  { %v987_v10 = vadd.f32 %v986_v63, %v985_v57 }
 0x1b1   :  { %v988_v60 = vrot.slane %v987_v10, 4 }
 0x1b3   :  { %v989_v61 = vadd.f32 %v988_v60, %v987_v10 }
 0x1b5   :  { %v990_v44 = vrot.slane %v989_v61, 2 }
 0x1b7   :  { %v991_v52 = vadd.f32 %v990_v44, %v989_v61 }
 0x1b9   :  { %v992_v12 = vrot.slane %v991_v52, 1 }
 0x1bb   :  { %v993_v58 = vadd.f32 %v992_v12, %v991_v52 }
 0x1bd   :  { %v994_v48 = vadd.f32 %v993_v58, %v963_v16 }
 0x1bf   :  { %996 = vst.msk [vmem:[#allocation2] sm:$0x1] %vm99_vm4, %v994_v48 }
 0x1c6   :  { %v1000_v62 = vld [vmem:[#allocation2] sm:$0x1] }
 0x1c7   :  { %v1001_v50 = vmul.f32 0.0052083335, %v1000_v62 }
 0x1c9   :  { %v1003_v0 = vperm.slane %v1001_v50, 0 }
 0x1cb   :  { %1005 = vperm.xlu0 %1157, %v1003_v0  }
 0x23d   :  { %v1006_v46 = vpop.permute.xlu0 %1005 }
 0x23e   :  { %1008 = vst [vmem:[#allocation9] sm:$0xff] %v1006_v46 }
 0x23f   :  { %1019 = dma.vmem_to_hbm [thread:$0]  %s1015_s1, 128, %s1017_s18, [#allocation6]  }
 0x240   :  { %1340 = dma.done.wait [#allocation6], 128  }
 0x241   :  { %1341 = vsyncadd [#allocation6], 4294967168 }
 0x242   :  { %1024 = vsyncpa [#allocation5], 1 }
 0x243   :  { %1025 = vsyncpa [#allocation8], 1 }
 0x244   :  { %1026 = vsyncpa [#allocation6], 1 }

</bundles_post_ra>
